<compile_context>
chip_gen: v7x
topology: tpu7x:2x2x1
jax: 0.10.0
libtpu: 0.0.40
codegen_flags: <defaults>
</compile_context>

<pallas_src>
import functools

import jax
import jax.numpy as jnp
from jax.experimental import pallas as pl
from jax.experimental.pallas import tpu as pltpu

NEG_SLOPE = 0.01   # nn.LeakyReLU default
EPS = 1e-5         # BatchNorm1d eps


def _fused_encoder_kernel(x_ref, w1_ref, w2_ref, w3_hbm, p1_ref, p2_ref, p3_ref,
                          o_ref,
                          stg1_ref, stg2_ref, stg3_ref, a1_ref, a2_ref,
                          w3_buf, w3_sem,
                          *, n_batch, k_taps, layer_dims):
    """Single fused kernel: 3 x (Conv1d -> LeakyReLU -> BatchNorm1d)."""

    # Kick off the w3 prefetch immediately: it is the largest input and is not
    # needed until the third conv, so its DMA overlaps layer-1/2 compute.
    w3_copy = pltpu.make_async_copy(w3_hbm, w3_buf, w3_sem)
    w3_copy.start()

    def stage(in_ref, stg_ref, l_in, l_out, stride):
        # im2col into a (k_taps*M, C_in) f32 slab, M = n_batch*l_out.  This merges
        # the batch into the matmul M dimension (conv windows must not cross batch
        # boundaries, hence per-sample strided row copies).  All offsets static.
        m = n_batch * l_out
        for kk in range(k_taps):
            for nb in range(n_batch):
                start = nb * l_in + kk
                if stride == 1:
                    rows = in_ref[pl.ds(start, l_out), :]
                else:
                    rows = in_ref[pl.ds(start, l_out, stride=stride), :]
                stg_ref[pl.ds(kk * m + nb * l_out, l_out), :] = rows

    def conv_lrelu_bn(stg_ref, w_ref, p_ref, out_ref, l_out):
        m = n_batch * l_out
        c_out = p_ref.shape[1]
        bias = p_ref[pl.ds(0, 1), :]      # (1, C_out) f32
        gamma = p_ref[pl.ds(1, 1), :]
        beta = p_ref[pl.ds(2, 1), :]

        # k_taps MXU matmuls with M = N*L_out, chained into one f32 accumulator.
        acc = jnp.zeros((m, c_out), jnp.float32)
        for kk in range(k_taps):
            lhs = stg_ref[pl.ds(kk * m, m), :].astype(w_ref.dtype)  # bf16 operand
            acc = acc + jnp.dot(lhs, w_ref[kk],
                                preferred_element_type=jnp.float32)

        y = acc + bias
        y = jnp.where(y > 0, y, NEG_SLOPE * y)            # LeakyReLU (f32)

        # BatchNorm1d: training-mode biased batch stats over the N*L_out rows,
        # two-pass (centered) variance, all f32.
        mean = jnp.mean(y, axis=0, keepdims=True)
        yc = y - mean
        var = jnp.mean(yc * yc, axis=0, keepdims=True)
        scale = jax.lax.rsqrt(var + EPS) * gamma
        # Single post-BN store: no read-modify-write pass over the activation.
        out_ref[...] = (yc * scale + beta).astype(out_ref.dtype)

    (li1, lo1, st1), (li2, lo2, st2), (li3, lo3, st3) = layer_dims

    stage(x_ref, stg1_ref, li1, lo1, st1)
    conv_lrelu_bn(stg1_ref, w1_ref, p1_ref, a1_ref, lo1)

    stage(a1_ref, stg2_ref, li2, lo2, st2)
    conv_lrelu_bn(stg2_ref, w2_ref, p2_ref, a2_ref, lo2)

    stage(a2_ref, stg3_ref, li3, lo3, st3)
    w3_copy.wait()                        # prefetched weights must have landed
    conv_lrelu_bn(stg3_ref, w3_buf, p3_ref, o_ref, lo3)


def encoder_forward(x_ncl, params, compute_dtype=jnp.bfloat16):
    """x_ncl: (N, C, L) f32; params: [(w, b, gamma, beta)] for the 3 blocks."""
    strides = (2, 2, 1)
    n, c0, l0 = x_ncl.shape
    k_taps = params[0][0].shape[2]

    layer_dims = []
    l_cur = l0
    for (w, _, _, _), s in zip(params, strides):
        k = w.shape[2]
        l_out = (l_cur - k) // s + 1
        layer_dims.append((l_cur, l_out, s))
        l_cur = l_out
    (_, l1, _), (_, l2, _), (_, l3, _) = layer_dims
    c1, c2, c3 = (p[0].shape[0] for p in params)

    # Wrapper-side glue on KB-sized arrays: NCL -> NLC rows; weights
    # (Cout,Cin,K) -> (K,Cin,Cout) cast to the MXU operand dtype (bf16 default:
    # halves the dominant weight DMA); (bias,gamma,beta) packed to one f32
    # (3,Cout) array per layer (the whole BN/LeakyReLU epilogue stays f32).
    x2d = jnp.transpose(x_ncl, (0, 2, 1)).reshape(n * l0, c0).astype(jnp.float32)
    ws = [jnp.transpose(w, (2, 1, 0)).astype(compute_dtype) for (w, _, _, _) in params]
    ps = [jnp.stack([b, g, be], axis=0).astype(jnp.float32) for (_, b, g, be) in params]

    kernel = functools.partial(
        _fused_encoder_kernel, n_batch=n, k_taps=k_taps,
        layer_dims=tuple(layer_dims))

    out2d = pl.pallas_call(
        kernel,
        out_shape=jax.ShapeDtypeStruct((n * l3, c3), jnp.float32),
        grid_spec=pltpu.PrefetchScalarGridSpec(
            num_scalar_prefetch=0,
            grid=(1,),
            in_specs=[
                pl.BlockSpec((n * l0, c0), lambda i: (0, 0)),
                pl.BlockSpec(ws[0].shape, lambda i: (0, 0, 0)),
                pl.BlockSpec(ws[1].shape, lambda i: (0, 0, 0)),
                pl.BlockSpec(memory_space=pl.ANY),        # w3: manual prefetch DMA
                pl.BlockSpec(ps[0].shape, lambda i: (0, 0)),
                pl.BlockSpec(ps[1].shape, lambda i: (0, 0)),
                pl.BlockSpec(ps[2].shape, lambda i: (0, 0)),
            ],
            out_specs=pl.BlockSpec((n * l3, c3), lambda i: (0, 0)),
            scratch_shapes=[
                pltpu.VMEM((k_taps * n * l1, c0), jnp.float32),   # stg1: L1 im2col
                pltpu.VMEM((k_taps * n * l2, c1), jnp.float32),   # stg2: L2 im2col
                pltpu.VMEM((k_taps * n * l3, c2), jnp.float32),   # stg3: L3 im2col
                pltpu.VMEM((n * l1, c1), jnp.float32),            # a1: layer-1 act
                pltpu.VMEM((n * l2, c2), jnp.float32),            # a2: layer-2 act
                pltpu.VMEM(ws[2].shape, compute_dtype),           # w3 prefetch buf
                pltpu.SemaphoreType.DMA(()),                      # w3 DMA semaphore
            ],
        ),
        compiler_params=pltpu.CompilerParams(
            dimension_semantics=("arbitrary",)),
        # TODO(synk): at production N*L, tile the row axis on a "parallel" grid
        # axis (v7x: 2 TCs, 64 MiB VMEM -> smaller tiles + explicit
        # vmem_limit_bytes), switch BN stats to a cross-tile accumulator
        # reduction, fold the taps into a single K=3*C_in matmul operand, and
        # move staging/activations to bf16 as well.
    )(x2d, ws[0], ws[1], ws[2], ps[0], ps[1], ps[2])

    # Flatten must match torch layout (N, C, L) -> (N, C*L): tiny glue transpose.
    return out2d.reshape(n, l3, c3).transpose(0, 2, 1).reshape(n, c3 * l3)


def ref_forward(x_ncl, params):
    """Pure-JAX reference (lax.conv) for validation."""
    strides = (2, 2, 1)
    h = x_ncl
    for (w, b, g, be), s in zip(params, strides):
        y = jax.lax.conv_general_dilated(
            h, w, window_strides=(s,), padding="VALID",
            dimension_numbers=("NCH", "OIH", "NCH"))
        y = y + b[None, :, None]
        y = jnp.where(y > 0, y, NEG_SLOPE * y)
        m = jnp.mean(y, axis=(0, 2), keepdims=True)
        v = jnp.mean((y - m) ** 2, axis=(0, 2), keepdims=True)
        h = (y - m) * jax.lax.rsqrt(v + EPS) * g[None, :, None] + be[None, :, None]
    return h.reshape(h.shape[0], -1)


# TODO(synk): BatchNorm1d running-mean/var (momentum=0.1) buffer updates are a
# training-time side effect not emitted here; the forward output (batch stats)
# matches the PyTorch module in training mode.

if __name__ == "__main__":
    key = jax.random.PRNGKey(0)
    N, C, L = 2, 52, 32  # num_channels=52; conv lengths 32 -> 15 -> 7 -> 5
    keys = jax.random.split(key, 8)
    x = jax.random.normal(keys[0], (N, C, L), dtype=jnp.float32)

    # Deterministic parameter init (PyTorch-style uniform bounds; BN gamma=1, beta=0)
    layer_specs = [(52, 64, 3), (64, 128, 3), (128, 256, 3)]
    params = []
    for i, (cin, cout, k) in enumerate(layer_specs):
        bound = 1.0 / (cin * k) ** 0.5
        w = jax.random.uniform(keys[1 + 2 * i], (cout, cin, k), jnp.float32, -bound, bound)
        b = jax.random.uniform(keys[2 + 2 * i], (cout,), jnp.float32, -bound, bound)
        params.append((w, b, jnp.ones((cout,), jnp.float32), jnp.zeros((cout,), jnp.float32)))

    ref = ref_forward(x, params)

    # f32 validation mode: operand dtypes match the reference -> tight tolerance.
    out_f32 = jax.block_until_ready(encoder_forward(x, params, compute_dtype=jnp.float32))
    assert out_f32.shape == ref.shape == (N, 256 * 5), (out_f32.shape, ref.shape)
    assert jnp.allclose(out_f32, ref, rtol=1e-3, atol=1e-3), float(jnp.max(jnp.abs(out_f32 - ref)))

    # Default performance mode: bf16 MXU operands, f32 accumulation + f32 BN
    # epilogue.  Tolerance reflects bf16 operand rounding through 3 conv+BN layers.
    out_bf16 = jax.block_until_ready(encoder_forward(x, params))
    assert out_bf16.shape == ref.shape
    assert jnp.allclose(out_bf16, ref, rtol=5e-2, atol=5e-2), float(jnp.max(jnp.abs(out_bf16 - ref)))

    print("KERNEL_OK")
</pallas_src>

<mosaic_0001>
module attributes {stable_mosaic.version = 11 : i64} {
  func.func @_fused_encoder_kernel(%arg0: i32, %arg1: memref<64x52xf32, #tpu.memory_space<vmem>>, %arg2: memref<3x52x64xf32, #tpu.memory_space<vmem>>, %arg3: memref<3x64x128xf32, #tpu.memory_space<vmem>>, %arg4: memref<3x128x256xf32, #tpu.memory_space<any>>, %arg5: memref<3x64xf32, #tpu.memory_space<vmem>>, %arg6: memref<3x128xf32, #tpu.memory_space<vmem>>, %arg7: memref<3x256xf32, #tpu.memory_space<vmem>>, %arg8: memref<10x256xf32, #tpu.memory_space<vmem>>, %arg9: memref<90x52xf32, #tpu.memory_space<vmem>>, %arg10: memref<42x64xf32, #tpu.memory_space<vmem>>, %arg11: memref<30x128xf32, #tpu.memory_space<vmem>>, %arg12: memref<30x64xf32, #tpu.memory_space<vmem>>, %arg13: memref<14x128xf32, #tpu.memory_space<vmem>>, %arg14: memref<3x128x256xf32, #tpu.memory_space<vmem>>, %arg15: memref<!tpu.dma_semaphore, #tpu.memory_space<semaphore_mem>>) attributes {dimension_semantics = [#tpu.dimension_semantics<arbitrary>], iteration_bounds = array<i64: 1>, scalar_prefetch = 0 : i64, scratch_operands = 7 : i64, tpu.core_type = #tpu.core_type<tc>, window_params = [{pipeline_mode = #tpu.pipeline_mode<synchronous>, transform_indices = @transform_0, window_bounds = array<i64: 64, 52>}, {pipeline_mode = #tpu.pipeline_mode<synchronous>, transform_indices = @transform_1, window_bounds = array<i64: 3, 52, 64>}, {pipeline_mode = #tpu.pipeline_mode<synchronous>, transform_indices = @transform_2, window_bounds = array<i64: 3, 64, 128>}, {}, {pipeline_mode = #tpu.pipeline_mode<synchronous>, transform_indices = @transform_4, window_bounds = array<i64: 3, 64>}, {pipeline_mode = #tpu.pipeline_mode<synchronous>, transform_indices = @transform_5, window_bounds = array<i64: 3, 128>}, {pipeline_mode = #tpu.pipeline_mode<synchronous>, transform_indices = @transform_6, window_bounds = array<i64: 3, 256>}, {pipeline_mode = #tpu.pipeline_mode<synchronous>, transform_indices = @transform_7, window_bounds = array<i64: 10, 256>}]} {
    tpu.enqueue_dma source(%arg4 : memref<3x128x256xf32, #tpu.memory_space<any>>) target(%arg14 : memref<3x128x256xf32, #tpu.memory_space<vmem>>) target_semaphore(%arg15 : memref<!tpu.dma_semaphore, #tpu.memory_space<semaphore_mem>>)
    %c0 = arith.constant 0 : index
    %c0_0 = arith.constant 0 : index
    %0 = tpu.strided_load %arg1[%c0, %c0_0] {strides = array<i32: 2, 1>} : memref<64x52xf32, #tpu.memory_space<vmem>>, vector<15x52xf32>
    %c0_1 = arith.constant 0 : index
    %c0_2 = arith.constant 0 : index
    %1 = vector.load %arg9[%c0_1, %c0_2] : memref<90x52xf32, #tpu.memory_space<vmem>>, vector<15x52xf32>
    tpu.vector_store %arg9[%c0_1, %c0_2], %0 {strides = array<i32>} : memref<90x52xf32, #tpu.memory_space<vmem>>, vector<15x52xf32>,
    %c32 = arith.constant 32 : index
    %c0_3 = arith.constant 0 : index
    %2 = tpu.strided_load %arg1[%c32, %c0_3] {strides = array<i32: 2, 1>} : memref<64x52xf32, #tpu.memory_space<vmem>>, vector<15x52xf32>
    %c15 = arith.constant 15 : index
    %c0_4 = arith.constant 0 : index
    %3 = vector.load %arg9[%c15, %c0_4] : memref<90x52xf32, #tpu.memory_space<vmem>>, vector<15x52xf32>
    tpu.vector_store %arg9[%c15, %c0_4], %2 {strides = array<i32>} : memref<90x52xf32, #tpu.memory_space<vmem>>, vector<15x52xf32>,
    %c1 = arith.constant 1 : index
    %c0_5 = arith.constant 0 : index
    %4 = tpu.strided_load %arg1[%c1, %c0_5] {strides = array<i32: 2, 1>} : memref<64x52xf32, #tpu.memory_space<vmem>>, vector<15x52xf32>
    %c30 = arith.constant 30 : index
    %c0_6 = arith.constant 0 : index
    %5 = vector.load %arg9[%c30, %c0_6] : memref<90x52xf32, #tpu.memory_space<vmem>>, vector<15x52xf32>
    tpu.vector_store %arg9[%c30, %c0_6], %4 {strides = array<i32>} : memref<90x52xf32, #tpu.memory_space<vmem>>, vector<15x52xf32>,
    %c33 = arith.constant 33 : index
    %c0_7 = arith.constant 0 : index
    %6 = tpu.strided_load %arg1[%c33, %c0_7] {strides = array<i32: 2, 1>} : memref<64x52xf32, #tpu.memory_space<vmem>>, vector<15x52xf32>
    %c45 = arith.constant 45 : index
    %c0_8 = arith.constant 0 : index
    %7 = vector.load %arg9[%c45, %c0_8] : memref<90x52xf32, #tpu.memory_space<vmem>>, vector<15x52xf32>
    tpu.vector_store %arg9[%c45, %c0_8], %6 {strides = array<i32>} : memref<90x52xf32, #tpu.memory_space<vmem>>, vector<15x52xf32>,
    %c2 = arith.constant 2 : index
    %c0_9 = arith.constant 0 : index
    %8 = tpu.strided_load %arg1[%c2, %c0_9] {strides = array<i32: 2, 1>} : memref<64x52xf32, #tpu.memory_space<vmem>>, vector<15x52xf32>
    %c60 = arith.constant 60 : index
    %c0_10 = arith.constant 0 : index
    %9 = vector.load %arg9[%c60, %c0_10] : memref<90x52xf32, #tpu.memory_space<vmem>>, vector<15x52xf32>
    tpu.vector_store %arg9[%c60, %c0_10], %8 {strides = array<i32>} : memref<90x52xf32, #tpu.memory_space<vmem>>, vector<15x52xf32>,
    %c34 = arith.constant 34 : index
    %c0_11 = arith.constant 0 : index
    %10 = tpu.strided_load %arg1[%c34, %c0_11] {strides = array<i32: 2, 1>} : memref<64x52xf32, #tpu.memory_space<vmem>>, vector<15x52xf32>
    %c75 = arith.constant 75 : index
    %c0_12 = arith.constant 0 : index
    %11 = vector.load %arg9[%c75, %c0_12] : memref<90x52xf32, #tpu.memory_space<vmem>>, vector<15x52xf32>
    tpu.vector_store %arg9[%c75, %c0_12], %10 {strides = array<i32>} : memref<90x52xf32, #tpu.memory_space<vmem>>, vector<15x52xf32>,
    %c0_13 = arith.constant 0 : index
    %c0_14 = arith.constant 0 : index
    %12 = vector.load %arg5[%c0_13, %c0_14] : memref<3x64xf32, #tpu.memory_space<vmem>>, vector<1x64xf32>
    %c1_15 = arith.constant 1 : index
    %c0_16 = arith.constant 0 : index
    %13 = vector.load %arg5[%c1_15, %c0_16] : memref<3x64xf32, #tpu.memory_space<vmem>>, vector<1x64xf32>
    %c2_17 = arith.constant 2 : index
    %c0_18 = arith.constant 0 : index
    %14 = vector.load %arg5[%c2_17, %c0_18] : memref<3x64xf32, #tpu.memory_space<vmem>>, vector<1x64xf32>
    %cst = arith.constant 0.000000e+00 : f32
    %15 = vector.broadcast %cst : f32 to vector<30x64xf32>
    %c0_19 = arith.constant 0 : index
    %c0_20 = arith.constant 0 : index
    %16 = vector.load %arg9[%c0_19, %c0_20] : memref<90x52xf32, #tpu.memory_space<vmem>>, vector<30x52xf32>
    %c0_21 = arith.constant 0 : index
    %c0_22 = arith.constant 0 : index
    %c0_23 = arith.constant 0 : index
    %17 = vector.load %arg2[%c0_21, %c0_22, %c0_23] : memref<3x52x64xf32, #tpu.memory_space<vmem>>, vector<1x52x64xf32>
    %18 = vector.shape_cast %17 : vector<1x52x64xf32> to vector<52x64xf32>
    %cst_24 = arith.constant dense<0.000000e+00> : vector<30x64xf32>
    %19 = tpu.matmul %16, %18, %cst_24 {dimension_numbers = #tpu.dot_dimension_numbers<[1], [0], [0], [1], [0, 0, 1, 1], [], []>} : vector<30x52xf32>, vector<52x64xf32>, vector<30x64xf32> -> vector<30x64xf32>
    %20 = arith.addf %15, %19 : vector<30x64xf32>
    %c30_25 = arith.constant 30 : index
    %c0_26 = arith.constant 0 : index
    %21 = vector.load %arg9[%c30_25, %c0_26] : memref<90x52xf32, #tpu.memory_space<vmem>>, vector<30x52xf32>
    %c1_27 = arith.constant 1 : index
    %c0_28 = arith.constant 0 : index
    %c0_29 = arith.constant 0 : index
    %22 = vector.load %arg2[%c1_27, %c0_28, %c0_29] : memref<3x52x64xf32, #tpu.memory_space<vmem>>, vector<1x52x64xf32>
    %23 = vector.shape_cast %22 : vector<1x52x64xf32> to vector<52x64xf32>
    %cst_30 = arith.constant dense<0.000000e+00> : vector<30x64xf32>
    %24 = tpu.matmul %21, %23, %cst_30 {dimension_numbers = #tpu.dot_dimension_numbers<[1], [0], [0], [1], [0, 0, 1, 1], [], []>} : vector<30x52xf32>, vector<52x64xf32>, vector<30x64xf32> -> vector<30x64xf32>
    %25 = arith.addf %20, %24 : vector<30x64xf32>
    %c60_31 = arith.constant 60 : index
    %c0_32 = arith.constant 0 : index
    %26 = vector.load %arg9[%c60_31, %c0_32] : memref<90x52xf32, #tpu.memory_space<vmem>>, vector<30x52xf32>
    %c2_33 = arith.constant 2 : index
    %c0_34 = arith.constant 0 : index
    %c0_35 = arith.constant 0 : index
    %27 = vector.load %arg2[%c2_33, %c0_34, %c0_35] : memref<3x52x64xf32, #tpu.memory_space<vmem>>, vector<1x52x64xf32>
    %28 = vector.shape_cast %27 : vector<1x52x64xf32> to vector<52x64xf32>
    %cst_36 = arith.constant dense<0.000000e+00> : vector<30x64xf32>
    %29 = tpu.matmul %26, %28, %cst_36 {dimension_numbers = #tpu.dot_dimension_numbers<[1], [0], [0], [1], [0, 0, 1, 1], [], []>} : vector<30x52xf32>, vector<52x64xf32>, vector<30x64xf32> -> vector<30x64xf32>
    %30 = arith.addf %25, %29 : vector<30x64xf32>
    %31 = vector.broadcast %12 : vector<1x64xf32> to vector<30x64xf32>
    %32 = arith.addf %30, %31 : vector<30x64xf32>
    %cst_37 = arith.constant 0.000000e+00 : f32
    %33 = vector.broadcast %cst_37 : f32 to vector<30x64xf32>
    %34 = arith.cmpf ogt, %32, %33 : vector<30x64xf32>
    %cst_38 = arith.constant 0.00999999977 : f32
    %35 = vector.broadcast %cst_38 : f32 to vector<30x64xf32>
    %36 = arith.mulf %35, %32 : vector<30x64xf32>
    %37 = arith.select %34, %32, %36 : vector<30x64xi1>, vector<30x64xf32>
    %cst_39 = arith.constant dense<0.000000e+00> : vector<64xf32>
    %38 = vector.multi_reduction <add>, %37, %cst_39 [0] : vector<30x64xf32> to vector<64xf32>
    %39 = vector.shape_cast %38 : vector<64xf32> to vector<1x64xf32>
    %cst_40 = arith.constant 3.000000e+01 : f32
    %40 = vector.broadcast %cst_40 : f32 to vector<1x64xf32>
    %41 = arith.divf %39, %40 : vector<1x64xf32>
    %42 = vector.broadcast %41 : vector<1x64xf32> to vector<30x64xf32>
    %43 = arith.subf %37, %42 : vector<30x64xf32>
    %44 = arith.mulf %43, %43 : vector<30x64xf32>
    %cst_41 = arith.constant dense<0.000000e+00> : vector<64xf32>
    %45 = vector.multi_reduction <add>, %44, %cst_41 [0] : vector<30x64xf32> to vector<64xf32>
    %46 = vector.shape_cast %45 : vector<64xf32> to vector<1x64xf32>
    %cst_42 = arith.constant 3.000000e+01 : f32
    %47 = vector.broadcast %cst_42 : f32 to vector<1x64xf32>
    %48 = arith.divf %46, %47 : vector<1x64xf32>
    %cst_43 = arith.constant 9.99999974E-6 : f32
    %49 = vector.broadcast %cst_43 : f32 to vector<1x64xf32>
    %50 = arith.addf %48, %49 : vector<1x64xf32>
    %51 = math.rsqrt %50 : vector<1x64xf32>
    %52 = arith.mulf %51, %13 : vector<1x64xf32>
    %53 = vector.broadcast %52 : vector<1x64xf32> to vector<30x64xf32>
    %54 = arith.mulf %43, %53 : vector<30x64xf32>
    %55 = vector.broadcast %14 : vector<1x64xf32> to vector<30x64xf32>
    %56 = arith.addf %54, %55 : vector<30x64xf32>
    %c0_44 = arith.constant 0 : index
    %c0_45 = arith.constant 0 : index
    %57 = vector.load %arg12[%c0_44, %c0_45] : memref<30x64xf32, #tpu.memory_space<vmem>>, vector<30x64xf32>
    tpu.vector_store %arg12[%c0_44, %c0_45], %56 {strides = array<i32>} : memref<30x64xf32, #tpu.memory_space<vmem>>, vector<30x64xf32>,
    %c0_46 = arith.constant 0 : index
    %c0_47 = arith.constant 0 : index
    %58 = tpu.strided_load %arg12[%c0_46, %c0_47] {strides = array<i32: 2, 1>} : memref<30x64xf32, #tpu.memory_space<vmem>>, vector<7x64xf32>
    %c0_48 = arith.constant 0 : index
    %c0_49 = arith.constant 0 : index
    %59 = vector.load %arg10[%c0_48, %c0_49] : memref<42x64xf32, #tpu.memory_space<vmem>>, vector<7x64xf32>
    tpu.vector_store %arg10[%c0_48, %c0_49], %58 {strides = array<i32>} : memref<42x64xf32, #tpu.memory_space<vmem>>, vector<7x64xf32>,
    %c15_50 = arith.constant 15 : index
    %c0_51 = arith.constant 0 : index
    %60 = tpu.strided_load %arg12[%c15_50, %c0_51] {strides = array<i32: 2, 1>} : memref<30x64xf32, #tpu.memory_space<vmem>>, vector<7x64xf32>
    %c7 = arith.constant 7 : index
    %c0_52 = arith.constant 0 : index
    %61 = vector.load %arg10[%c7, %c0_52] : memref<42x64xf32, #tpu.memory_space<vmem>>, vector<7x64xf32>
    tpu.vector_store %arg10[%c7, %c0_52], %60 {strides = array<i32>} : memref<42x64xf32, #tpu.memory_space<vmem>>, vector<7x64xf32>,
    %c1_53 = arith.constant 1 : index
    %c0_54 = arith.constant 0 : index
    %62 = tpu.strided_load %arg12[%c1_53, %c0_54] {strides = array<i32: 2, 1>} : memref<30x64xf32, #tpu.memory_space<vmem>>, vector<7x64xf32>
    %c14 = arith.constant 14 : index
    %c0_55 = arith.constant 0 : index
    %63 = vector.load %arg10[%c14, %c0_55] : memref<42x64xf32, #tpu.memory_space<vmem>>, vector<7x64xf32>
    tpu.vector_store %arg10[%c14, %c0_55], %62 {strides = array<i32>} : memref<42x64xf32, #tpu.memory_space<vmem>>, vector<7x64xf32>,
    %c16 = arith.constant 16 : index
    %c0_56 = arith.constant 0 : index
    %64 = tpu.strided_load %arg12[%c16, %c0_56] {strides = array<i32: 2, 1>} : memref<30x64xf32, #tpu.memory_space<vmem>>, vector<7x64xf32>
    %c21 = arith.constant 21 : index
    %c0_57 = arith.constant 0 : index
    %65 = vector.load %arg10[%c21, %c0_57] : memref<42x64xf32, #tpu.memory_space<vmem>>, vector<7x64xf32>
    tpu.vector_store %arg10[%c21, %c0_57], %64 {strides = array<i32>} : memref<42x64xf32, #tpu.memory_space<vmem>>, vector<7x64xf32>,
    %c2_58 = arith.constant 2 : index
    %c0_59 = arith.constant 0 : index
    %66 = tpu.strided_load %arg12[%c2_58, %c0_59] {strides = array<i32: 2, 1>} : memref<30x64xf32, #tpu.memory_space<vmem>>, vector<7x64xf32>
    %c28 = arith.constant 28 : index
    %c0_60 = arith.constant 0 : index
    %67 = vector.load %arg10[%c28, %c0_60] : memref<42x64xf32, #tpu.memory_space<vmem>>, vector<7x64xf32>
    tpu.vector_store %arg10[%c28, %c0_60], %66 {strides = array<i32>} : memref<42x64xf32, #tpu.memory_space<vmem>>, vector<7x64xf32>,
    %c17 = arith.constant 17 : index
    %c0_61 = arith.constant 0 : index
    %68 = tpu.strided_load %arg12[%c17, %c0_61] {strides = array<i32: 2, 1>} : memref<30x64xf32, #tpu.memory_space<vmem>>, vector<7x64xf32>
    %c35 = arith.constant 35 : index
    %c0_62 = arith.constant 0 : index
    %69 = vector.load %arg10[%c35, %c0_62] : memref<42x64xf32, #tpu.memory_space<vmem>>, vector<7x64xf32>
    tpu.vector_store %arg10[%c35, %c0_62], %68 {strides = array<i32>} : memref<42x64xf32, #tpu.memory_space<vmem>>, vector<7x64xf32>,
    %c0_63 = arith.constant 0 : index
    %c0_64 = arith.constant 0 : index
    %70 = vector.load %arg6[%c0_63, %c0_64] : memref<3x128xf32, #tpu.memory_space<vmem>>, vector<1x128xf32>
    %c1_65 = arith.constant 1 : index
    %c0_66 = arith.constant 0 : index
    %71 = vector.load %arg6[%c1_65, %c0_66] : memref<3x128xf32, #tpu.memory_space<vmem>>, vector<1x128xf32>
    %c2_67 = arith.constant 2 : index
    %c0_68 = arith.constant 0 : index
    %72 = vector.load %arg6[%c2_67, %c0_68] : memref<3x128xf32, #tpu.memory_space<vmem>>, vector<1x128xf32>
    %cst_69 = arith.constant 0.000000e+00 : f32
    %73 = vector.broadcast %cst_69 : f32 to vector<14x128xf32>
    %c0_70 = arith.constant 0 : index
    %c0_71 = arith.constant 0 : index
    %74 = vector.load %arg10[%c0_70, %c0_71] : memref<42x64xf32, #tpu.memory_space<vmem>>, vector<14x64xf32>
    %c0_72 = arith.constant 0 : index
    %c0_73 = arith.constant 0 : index
    %c0_74 = arith.constant 0 : index
    %75 = vector.load %arg3[%c0_72, %c0_73, %c0_74] : memref<3x64x128xf32, #tpu.memory_space<vmem>>, vector<1x64x128xf32>
    %76 = vector.shape_cast %75 : vector<1x64x128xf32> to vector<64x128xf32>
    %cst_75 = arith.constant dense<0.000000e+00> : vector<14x128xf32>
    %77 = tpu.matmul %74, %76, %cst_75 {dimension_numbers = #tpu.dot_dimension_numbers<[1], [0], [0], [1], [0, 0, 1, 1], [], []>} : vector<14x64xf32>, vector<64x128xf32>, vector<14x128xf32> -> vector<14x128xf32>
    %78 = arith.addf %73, %77 : vector<14x128xf32>
    %c14_76 = arith.constant 14 : index
    %c0_77 = arith.constant 0 : index
    %79 = vector.load %arg10[%c14_76, %c0_77] : memref<42x64xf32, #tpu.memory_space<vmem>>, vector<14x64xf32>
    %c1_78 = arith.constant 1 : index
    %c0_79 = arith.constant 0 : index
    %c0_80 = arith.constant 0 : index
    %80 = vector.load %arg3[%c1_78, %c0_79, %c0_80] : memref<3x64x128xf32, #tpu.memory_space<vmem>>, vector<1x64x128xf32>
    %81 = vector.shape_cast %80 : vector<1x64x128xf32> to vector<64x128xf32>
    %cst_81 = arith.constant dense<0.000000e+00> : vector<14x128xf32>
    %82 = tpu.matmul %79, %81, %cst_81 {dimension_numbers = #tpu.dot_dimension_numbers<[1], [0], [0], [1], [0, 0, 1, 1], [], []>} : vector<14x64xf32>, vector<64x128xf32>, vector<14x128xf32> -> vector<14x128xf32>
    %83 = arith.addf %78, %82 : vector<14x128xf32>
    %c28_82 = arith.constant 28 : index
    %c0_83 = arith.constant 0 : index
    %84 = vector.load %arg10[%c28_82, %c0_83] : memref<42x64xf32, #tpu.memory_space<vmem>>, vector<14x64xf32>
    %c2_84 = arith.constant 2 : index
    %c0_85 = arith.constant 0 : index
    %c0_86 = arith.constant 0 : index
    %85 = vector.load %arg3[%c2_84, %c0_85, %c0_86] : memref<3x64x128xf32, #tpu.memory_space<vmem>>, vector<1x64x128xf32>
    %86 = vector.shape_cast %85 : vector<1x64x128xf32> to vector<64x128xf32>
    %cst_87 = arith.constant dense<0.000000e+00> : vector<14x128xf32>
    %87 = tpu.matmul %84, %86, %cst_87 {dimension_numbers = #tpu.dot_dimension_numbers<[1], [0], [0], [1], [0, 0, 1, 1], [], []>} : vector<14x64xf32>, vector<64x128xf32>, vector<14x128xf32> -> vector<14x128xf32>
    %88 = arith.addf %83, %87 : vector<14x128xf32>
    %89 = vector.broadcast %70 : vector<1x128xf32> to vector<14x128xf32>
    %90 = arith.addf %88, %89 : vector<14x128xf32>
    %cst_88 = arith.constant 0.000000e+00 : f32
    %91 = vector.broadcast %cst_88 : f32 to vector<14x128xf32>
    %92 = arith.cmpf ogt, %90, %91 : vector<14x128xf32>
    %cst_89 = arith.constant 0.00999999977 : f32
    %93 = vector.broadcast %cst_89 : f32 to vector<14x128xf32>
    %94 = arith.mulf %93, %90 : vector<14x128xf32>
    %95 = arith.select %92, %90, %94 : vector<14x128xi1>, vector<14x128xf32>
    %cst_90 = arith.constant dense<0.000000e+00> : vector<128xf32>
    %96 = vector.multi_reduction <add>, %95, %cst_90 [0] : vector<14x128xf32> to vector<128xf32>
    %97 = vector.shape_cast %96 : vector<128xf32> to vector<1x128xf32>
    %cst_91 = arith.constant 1.400000e+01 : f32
    %98 = vector.broadcast %cst_91 : f32 to vector<1x128xf32>
    %99 = arith.divf %97, %98 : vector<1x128xf32>
    %100 = vector.broadcast %99 : vector<1x128xf32> to vector<14x128xf32>
    %101 = arith.subf %95, %100 : vector<14x128xf32>
    %102 = arith.mulf %101, %101 : vector<14x128xf32>
    %cst_92 = arith.constant dense<0.000000e+00> : vector<128xf32>
    %103 = vector.multi_reduction <add>, %102, %cst_92 [0] : vector<14x128xf32> to vector<128xf32>
    %104 = vector.shape_cast %103 : vector<128xf32> to vector<1x128xf32>
    %cst_93 = arith.constant 1.400000e+01 : f32
    %105 = vector.broadcast %cst_93 : f32 to vector<1x128xf32>
    %106 = arith.divf %104, %105 : vector<1x128xf32>
    %cst_94 = arith.constant 9.99999974E-6 : f32
    %107 = vector.broadcast %cst_94 : f32 to vector<1x128xf32>
    %108 = arith.addf %106, %107 : vector<1x128xf32>
    %109 = math.rsqrt %108 : vector<1x128xf32>
    %110 = arith.mulf %109, %71 : vector<1x128xf32>
    %111 = vector.broadcast %110 : vector<1x128xf32> to vector<14x128xf32>
    %112 = arith.mulf %101, %111 : vector<14x128xf32>
    %113 = vector.broadcast %72 : vector<1x128xf32> to vector<14x128xf32>
    %114 = arith.addf %112, %113 : vector<14x128xf32>
    %c0_95 = arith.constant 0 : index
    %c0_96 = arith.constant 0 : index
    %115 = vector.load %arg13[%c0_95, %c0_96] : memref<14x128xf32, #tpu.memory_space<vmem>>, vector<14x128xf32>
    tpu.vector_store %arg13[%c0_95, %c0_96], %114 {strides = array<i32>} : memref<14x128xf32, #tpu.memory_space<vmem>>, vector<14x128xf32>,
    %c0_97 = arith.constant 0 : index
    %c0_98 = arith.constant 0 : index
    %116 = vector.load %arg13[%c0_97, %c0_98] : memref<14x128xf32, #tpu.memory_space<vmem>>, vector<5x128xf32>
    %c0_99 = arith.constant 0 : index
    %c0_100 = arith.constant 0 : index
    %117 = vector.load %arg11[%c0_99, %c0_100] : memref<30x128xf32, #tpu.memory_space<vmem>>, vector<5x128xf32>
    tpu.vector_store %arg11[%c0_99, %c0_100], %116 {strides = array<i32>} : memref<30x128xf32, #tpu.memory_space<vmem>>, vector<5x128xf32>,
    %c7_101 = arith.constant 7 : index
    %c0_102 = arith.constant 0 : index
    %118 = vector.load %arg13[%c7_101, %c0_102] : memref<14x128xf32, #tpu.memory_space<vmem>>, vector<5x128xf32>
    %c5 = arith.constant 5 : index
    %c0_103 = arith.constant 0 : index
    %119 = vector.load %arg11[%c5, %c0_103] : memref<30x128xf32, #tpu.memory_space<vmem>>, vector<5x128xf32>
    tpu.vector_store %arg11[%c5, %c0_103], %118 {strides = array<i32>} : memref<30x128xf32, #tpu.memory_space<vmem>>, vector<5x128xf32>,
    %c1_104 = arith.constant 1 : index
    %c0_105 = arith.constant 0 : index
    %120 = vector.load %arg13[%c1_104, %c0_105] : memref<14x128xf32, #tpu.memory_space<vmem>>, vector<5x128xf32>
    %c10 = arith.constant 10 : index
    %c0_106 = arith.constant 0 : index
    %121 = vector.load %arg11[%c10, %c0_106] : memref<30x128xf32, #tpu.memory_space<vmem>>, vector<5x128xf32>
    tpu.vector_store %arg11[%c10, %c0_106], %120 {strides = array<i32>} : memref<30x128xf32, #tpu.memory_space<vmem>>, vector<5x128xf32>,
    %c8 = arith.constant 8 : index
    %c0_107 = arith.constant 0 : index
    %122 = vector.load %arg13[%c8, %c0_107] : memref<14x128xf32, #tpu.memory_space<vmem>>, vector<5x128xf32>
    %c15_108 = arith.constant 15 : index
    %c0_109 = arith.constant 0 : index
    %123 = vector.load %arg11[%c15_108, %c0_109] : memref<30x128xf32, #tpu.memory_space<vmem>>, vector<5x128xf32>
    tpu.vector_store %arg11[%c15_108, %c0_109], %122 {strides = array<i32>} : memref<30x128xf32, #tpu.memory_space<vmem>>, vector<5x128xf32>,
    %c2_110 = arith.constant 2 : index
    %c0_111 = arith.constant 0 : index
    %124 = vector.load %arg13[%c2_110, %c0_111] : memref<14x128xf32, #tpu.memory_space<vmem>>, vector<5x128xf32>
    %c20 = arith.constant 20 : index
    %c0_112 = arith.constant 0 : index
    %125 = vector.load %arg11[%c20, %c0_112] : memref<30x128xf32, #tpu.memory_space<vmem>>, vector<5x128xf32>
    tpu.vector_store %arg11[%c20, %c0_112], %124 {strides = array<i32>} : memref<30x128xf32, #tpu.memory_space<vmem>>, vector<5x128xf32>,
    %c9 = arith.constant 9 : index
    %c0_113 = arith.constant 0 : index
    %126 = vector.load %arg13[%c9, %c0_113] : memref<14x128xf32, #tpu.memory_space<vmem>>, vector<5x128xf32>
    %c25 = arith.constant 25 : index
    %c0_114 = arith.constant 0 : index
    %127 = vector.load %arg11[%c25, %c0_114] : memref<30x128xf32, #tpu.memory_space<vmem>>, vector<5x128xf32>
    tpu.vector_store %arg11[%c25, %c0_114], %126 {strides = array<i32>} : memref<30x128xf32, #tpu.memory_space<vmem>>, vector<5x128xf32>,
    tpu.wait_dma2 semaphore(%arg15 : memref<!tpu.dma_semaphore, #tpu.memory_space<semaphore_mem>>) src(%arg4 : memref<3x128x256xf32, #tpu.memory_space<any>>) dst(%arg14 : memref<3x128x256xf32, #tpu.memory_space<vmem>>)
    %c0_115 = arith.constant 0 : index
    %c0_116 = arith.constant 0 : index
    %128 = vector.load %arg7[%c0_115, %c0_116] : memref<3x256xf32, #tpu.memory_space<vmem>>, vector<1x256xf32>
    %c1_117 = arith.constant 1 : index
    %c0_118 = arith.constant 0 : index
    %129 = vector.load %arg7[%c1_117, %c0_118] : memref<3x256xf32, #tpu.memory_space<vmem>>, vector<1x256xf32>
    %c2_119 = arith.constant 2 : index
    %c0_120 = arith.constant 0 : index
    %130 = vector.load %arg7[%c2_119, %c0_120] : memref<3x256xf32, #tpu.memory_space<vmem>>, vector<1x256xf32>
    %cst_121 = arith.constant 0.000000e+00 : f32
    %131 = vector.broadcast %cst_121 : f32 to vector<10x256xf32>
    %c0_122 = arith.constant 0 : index
    %c0_123 = arith.constant 0 : index
    %132 = vector.load %arg11[%c0_122, %c0_123] : memref<30x128xf32, #tpu.memory_space<vmem>>, vector<10x128xf32>
    %c0_124 = arith.constant 0 : index
    %c0_125 = arith.constant 0 : index
    %c0_126 = arith.constant 0 : index
    %133 = vector.load %arg14[%c0_124, %c0_125, %c0_126] : memref<3x128x256xf32, #tpu.memory_space<vmem>>, vector<1x128x256xf32>
    %134 = vector.shape_cast %133 : vector<1x128x256xf32> to vector<128x256xf32>
    %cst_127 = arith.constant dense<0.000000e+00> : vector<10x256xf32>
    %135 = tpu.matmul %132, %134, %cst_127 {dimension_numbers = #tpu.dot_dimension_numbers<[1], [0], [0], [1], [0, 0, 1, 1], [], []>} : vector<10x128xf32>, vector<128x256xf32>, vector<10x256xf32> -> vector<10x256xf32>
    %136 = arith.addf %131, %135 : vector<10x256xf32>
    %c10_128 = arith.constant 10 : index
    %c0_129 = arith.constant 0 : index
    %137 = vector.load %arg11[%c10_128, %c0_129] : memref<30x128xf32, #tpu.memory_space<vmem>>, vector<10x128xf32>
    %c1_130 = arith.constant 1 : index
    %c0_131 = arith.constant 0 : index
    %c0_132 = arith.constant 0 : index
    %138 = vector.load %arg14[%c1_130, %c0_131, %c0_132] : memref<3x128x256xf32, #tpu.memory_space<vmem>>, vector<1x128x256xf32>
    %139 = vector.shape_cast %138 : vector<1x128x256xf32> to vector<128x256xf32>
    %cst_133 = arith.constant dense<0.000000e+00> : vector<10x256xf32>
    %140 = tpu.matmul %137, %139, %cst_133 {dimension_numbers = #tpu.dot_dimension_numbers<[1], [0], [0], [1], [0, 0, 1, 1], [], []>} : vector<10x128xf32>, vector<128x256xf32>, vector<10x256xf32> -> vector<10x256xf32>
    %141 = arith.addf %136, %140 : vector<10x256xf32>
    %c20_134 = arith.constant 20 : index
    %c0_135 = arith.constant 0 : index
    %142 = vector.load %arg11[%c20_134, %c0_135] : memref<30x128xf32, #tpu.memory_space<vmem>>, vector<10x128xf32>
    %c2_136 = arith.constant 2 : index
    %c0_137 = arith.constant 0 : index
    %c0_138 = arith.constant 0 : index
    %143 = vector.load %arg14[%c2_136, %c0_137, %c0_138] : memref<3x128x256xf32, #tpu.memory_space<vmem>>, vector<1x128x256xf32>
    %144 = vector.shape_cast %143 : vector<1x128x256xf32> to vector<128x256xf32>
    %cst_139 = arith.constant dense<0.000000e+00> : vector<10x256xf32>
    %145 = tpu.matmul %142, %144, %cst_139 {dimension_numbers = #tpu.dot_dimension_numbers<[1], [0], [0], [1], [0, 0, 1, 1], [], []>} : vector<10x128xf32>, vector<128x256xf32>, vector<10x256xf32> -> vector<10x256xf32>
    %146 = arith.addf %141, %145 : vector<10x256xf32>
    %147 = vector.broadcast %128 : vector<1x256xf32> to vector<10x256xf32>
    %148 = arith.addf %146, %147 : vector<10x256xf32>
    %cst_140 = arith.constant 0.000000e+00 : f32
    %149 = vector.broadcast %cst_140 : f32 to vector<10x256xf32>
    %150 = arith.cmpf ogt, %148, %149 : vector<10x256xf32>
    %cst_141 = arith.constant 0.00999999977 : f32
    %151 = vector.broadcast %cst_141 : f32 to vector<10x256xf32>
    %152 = arith.mulf %151, %148 : vector<10x256xf32>
    %153 = arith.select %150, %148, %152 : vector<10x256xi1>, vector<10x256xf32>
    %cst_142 = arith.constant dense<0.000000e+00> : vector<256xf32>
    %154 = vector.multi_reduction <add>, %153, %cst_142 [0] : vector<10x256xf32> to vector<256xf32>
    %155 = vector.shape_cast %154 : vector<256xf32> to vector<1x256xf32>
    %cst_143 = arith.constant 1.000000e+01 : f32
    %156 = vector.broadcast %cst_143 : f32 to vector<1x256xf32>
    %157 = arith.divf %155, %156 : vector<1x256xf32>
    %158 = vector.broadcast %157 : vector<1x256xf32> to vector<10x256xf32>
    %159 = arith.subf %153, %158 : vector<10x256xf32>
    %160 = arith.mulf %159, %159 : vector<10x256xf32>
    %cst_144 = arith.constant dense<0.000000e+00> : vector<256xf32>
    %161 = vector.multi_reduction <add>, %160, %cst_144 [0] : vector<10x256xf32> to vector<256xf32>
    %162 = vector.shape_cast %161 : vector<256xf32> to vector<1x256xf32>
    %cst_145 = arith.constant 1.000000e+01 : f32
    %163 = vector.broadcast %cst_145 : f32 to vector<1x256xf32>
    %164 = arith.divf %162, %163 : vector<1x256xf32>
    %cst_146 = arith.constant 9.99999974E-6 : f32
    %165 = vector.broadcast %cst_146 : f32 to vector<1x256xf32>
    %166 = arith.addf %164, %165 : vector<1x256xf32>
    %167 = math.rsqrt %166 : vector<1x256xf32>
    %168 = arith.mulf %167, %129 : vector<1x256xf32>
    %169 = vector.broadcast %168 : vector<1x256xf32> to vector<10x256xf32>
    %170 = arith.mulf %159, %169 : vector<10x256xf32>
    %171 = vector.broadcast %130 : vector<1x256xf32> to vector<10x256xf32>
    %172 = arith.addf %170, %171 : vector<10x256xf32>
    %c0_147 = arith.constant 0 : index
    %c0_148 = arith.constant 0 : index
    %173 = vector.load %arg8[%c0_147, %c0_148] : memref<10x256xf32, #tpu.memory_space<vmem>>, vector<10x256xf32>
    tpu.vector_store %arg8[%c0_147, %c0_148], %172 {strides = array<i32>} : memref<10x256xf32, #tpu.memory_space<vmem>>, vector<10x256xf32>,
    return
  }
  func.func @transform_0(%arg0: i32) -> (i32, i32) {
    %c0_i32 = arith.constant 0 : i32
    %c0_i32_0 = arith.constant 0 : i32
    %c0_i32_1 = arith.constant 0 : i32
    return %c0_i32, %c0_i32_0 : i32, i32
  }
  func.func @transform_1(%arg0: i32) -> (i32, i32, i32) {
    %c0_i32 = arith.constant 0 : i32
    %c0_i32_0 = arith.constant 0 : i32
    %c0_i32_1 = arith.constant 0 : i32
    %c0_i32_2 = arith.constant 0 : i32
    return %c0_i32, %c0_i32_0, %c0_i32_1 : i32, i32, i32
  }
  func.func @transform_2(%arg0: i32) -> (i32, i32, i32) {
    %c0_i32 = arith.constant 0 : i32
    %c0_i32_0 = arith.constant 0 : i32
    %c0_i32_1 = arith.constant 0 : i32
    %c0_i32_2 = arith.constant 0 : i32
    return %c0_i32, %c0_i32_0, %c0_i32_1 : i32, i32, i32
  }
  func.func @transform_4(%arg0: i32) -> (i32, i32) {
    %c0_i32 = arith.constant 0 : i32
    %c0_i32_0 = arith.constant 0 : i32
    %c0_i32_1 = arith.constant 0 : i32
    return %c0_i32, %c0_i32_0 : i32, i32
  }
  func.func @transform_5(%arg0: i32) -> (i32, i32) {
    %c0_i32 = arith.constant 0 : i32
    %c0_i32_0 = arith.constant 0 : i32
    %c0_i32_1 = arith.constant 0 : i32
    return %c0_i32, %c0_i32_0 : i32, i32
  }
  func.func @transform_6(%arg0: i32) -> (i32, i32) {
    %c0_i32 = arith.constant 0 : i32
    %c0_i32_0 = arith.constant 0 : i32
    %c0_i32_1 = arith.constant 0 : i32
    return %c0_i32, %c0_i32_0 : i32, i32
  }
  func.func @transform_7(%arg0: i32) -> (i32, i32) {
    %c0_i32 = arith.constant 0 : i32
    %c0_i32_0 = arith.constant 0 : i32
    %c0_i32_1 = arith.constant 0 : i32
    return %c0_i32, %c0_i32_0 : i32, i32
  }
}

</mosaic_0001>

<bundles_post_ra>
// kernel: tpu_custom_call.1
= control target key start
LH: loop header
LB: loop body
LE: loop exit
PB: predicated region body
PF: predicated region fallthrough
CT: control target
= control target key end

     0   :  { %12 = vsyncpa [#allocation10], 0  ;;  %s2157_s0 = inlined_call_operand.vmem [shape: f32[64,52], index: 0, kind: input, shape index: {}]   ;;  %s2158_s1 = inlined_call_operand.hbm [shape: f32[3,52,64], index: 1, kind: input, shape index: {}]   ;;  %s2159_s2 = inlined_call_operand.hbm [shape: f32[3,64,128], index: 2, kind: input, shape index: {}]   ;;  %s2160_s3 = inlined_call_operand.hbm [shape: f32[3,128,256], index: 3, kind: input, shape index: {}]   ;;  %s2161_s4 = inlined_call_operand.vmem [shape: f32[3,64], index: 4, kind: input, shape index: {}]   ;;  %s2162_s5 = inlined_call_operand.vmem [shape: f32[3,128], index: 5, kind: input, shape index: {}]   ;;  %s2163_s6 = inlined_call_operand.vmem [shape: f32[3,256], index: 6, kind: input, shape index: {}]   ;;  %s2164_s7 = inlined_call_operand.hbm [shape: f32[10,256], index: 7, kind: output, shape index: {}]  }
   0x1   :  { %13 = vsyncpa [#allocation13], 0 }
   0x2   :  { %14 = vsyncpa [#allocation11], 0  ;;  %s1915_s24 = smov [#allocation9]   ;;  %s1819_s28 = scalar_lea.hbm %s2158_s1, 2688 }
   0x3   :  { %s22_s25 = sshll.u32 %s1915_s24, 4  ;;  %p1820_p0 = scmp.ne.s32.totalorder %s2158_s1, %s1819_s28  ;;  %s23_s25 = int_to_ptr.vmem [resolvable:$true] %s22_s25 }
   0x4   :  { %p1823_p1 = scmp.lt.u32.totalorder %s1819_s28, %s2158_s1 }
   0x6   :  { %p1825_p2 = pnand %p1823_p1, %p1820_p0 }
   0x8   :  { %1828 = shalt.err (!%p1825_p2)
}
   0x9   :  { %s1829_s10 = scalar_lea.vmem %s23_s25, 2688  ;;  %p1834_p4 = scmp.lt.s32.totalorder %s23_s25, %s23_s25 }
   0xa   :  { %p1830_p3 = scmp.ne.s32.totalorder %s23_s25, %s1829_s10  ;;  %p1835_p5 = scmp.lt.s32.totalorder %s1829_s10, %s1829_s10 }
   0xc   :  { %p1836_p6 = por %p1835_p5, %p1834_p4 }
   0xe   :  { %p1837_p7 = pnand %p1836_p6, %p1830_p3 }
  0x10   :  { %1840 = shalt.err (!%p1837_p7)
}
  0x11   :  { %s1916_s11 = smov 128   ;;  %s1917_s12 = smov 8  }
  0x12   :  { %28 = dma.hbm_to_vmem [thread:$0]  %s2158_s1, 2688, %s23_s25, [#allocation10], %s1916_s11, %s1916_s11, %s1917_s12  }
  0x13   :  { %s1918_s15 = smov [#allocation12]   ;;  %s1841_s19 = scalar_lea.hbm %s2159_s2, 3072 }
  0x14   :  { %s34_s16 = sshll.u32 %s1918_s15, 4  ;;  %p1842_p8 = scmp.ne.s32.totalorder %s2159_s2, %s1841_s19  ;;  %s35_s16 = int_to_ptr.vmem [resolvable:$true] %s34_s16 }
  0x15   :  { %p1845_p9 = scmp.lt.u32.totalorder %s1841_s19, %s2159_s2 }
  0x17   :  { %p1847_p10 = pnand %p1845_p9, %p1842_p8 }
  0x19   :  { %1850 = shalt.err (!%p1847_p10)
}
  0x1a   :  { %s1851_s24 = scalar_lea.vmem %s35_s16, 3072  ;;  %p1856_p12 = scmp.lt.s32.totalorder %s35_s16, %s35_s16 }
  0x1b   :  { %p1852_p11 = scmp.ne.s32.totalorder %s35_s16, %s1851_s24  ;;  %p1857_p13 = scmp.lt.s32.totalorder %s1851_s24, %s1851_s24 }
  0x1d   :  { %p1858_p0 = por %p1857_p13, %p1856_p12 }
  0x1f   :  { %p1859_p1 = pnand %p1858_p0, %p1852_p11 }
  0x21   :  { %1862 = shalt.err (!%p1859_p1)
}
  0x22   :  { %40 = dma.hbm_to_vmem [thread:$0]  %s2159_s2, 3072, %s35_s16, [#allocation13], %s1916_s11, %s1916_s11, %s1917_s12  }
  0x23   :  { %1907 = dma.done.wait [#allocation10], 2688  }
  0x24   :  { %1908 = vsyncadd [#allocation10], 4294964608 }
  0x25   :  { %1909 = dma.done.wait [#allocation13], 3072  }
  0x26   :  { %1910 = vsyncadd [#allocation13], 4294964224  ;;  %v108_v0 = vld [vmem:[#allocation9] sm:$0xff]  ;;  %v109_v1 = vld [vmem:[#allocation9 + $0x8] sm:$0xff]  ;;  %vm67_vm0 = vcmask 424960   ;;  %vm69_vm1 = vcmask 423936  }
  0x27   :  { %v110_v2 = vld [vmem:[#allocation9 + $0x10] sm:$0xff]  ;;  %v1614_v3 = vpack.c.bf16 %v109_v1, %v108_v0  ;;  %v111_v4 = vld [vmem:[#allocation9 + $0x18] sm:$0xff]  ;;  %v112_v5 = vld [vmem:[#allocation9 + $0x20] sm:$0xff]  ;;  %vm139_vm2 = vcmask 1043456   ;;  %vm464_vm4 = vcmask 523264   ;;  %vm470_vm8 = vcmask 521216  }
  0x28   :  { %v1618_v6 = vpack.c.bf16 %v111_v4, %v110_v2  ;;  %v113_v7 = vld [vmem:[#allocation9 + $0x28] sm:$0xff]  ;;  %v120_v8 = vld [vmem:[#allocation9 + $0x38] sm:$0xff]  ;;  %v121_v9 = vld [vmem:[#allocation9 + $0x40] sm:$0xff]  ;;  %vm527_vm9 = vcmask 522240   ;;  %s1863_s9 = scalar_lea.hbm %s2160_s3, 12288 }
  0x29   :  { %1615 = vmatprep.subr.bf16.mxu0 %v1614_v3  ;;  %v1602_v10 = vpack.c.bf16 %v121_v9, %v120_v8  ;;  %v64_v11 = vld [vmem:[%s2157_s0] ss:$2 sm:$0xff]  ;;  %v1383_v12 = vld [vmem:[%s2157_s0 + $0x10] ss:$2 sm:$0x7f]  ;;  %v1622_v15 = vpack.c.bf16 %v113_v7, %v112_v5  ;;  %p1864_p2 = scmp.ne.s32.totalorder %s2160_s3, %s1863_s9  ;;  %p1867_p3 = scmp.lt.u32.totalorder %s1863_s9, %s2160_s3 }
  0x2a   :  { %1617 = vmatpush3.bf16.msra.mxu0 %v1614_v3  ;;  %68 = vst.msk [vmem:[#allocation2] sm:$0xff] %vm67_vm0, %v64_v11  ;;  %v1384_v13 = vld [vmem:[%s2157_s0 + $0x20] ss:$2 sm:$0xff]  ;;  %v123_v16 = vld [vmem:[#allocation9 + $0x50] sm:$0xff]  ;;  %v124_v18 = vld [vmem:[#allocation9 + $0x58] sm:$0xff] }
  0x2b   :  { %v122_v14 = vld [vmem:[#allocation9 + $0x48] sm:$0xff]  ;;  %1619 = vmatprep.subr.bf16.mxu0 %v1618_v6  ;;  %1603 = vmatprep.subr.bf16.mxu1 %v1602_v10  ;;  %70 = vst.msk [vmem:[#allocation2 + $0x8] sm:$0x7f] %vm69_vm1, %v1383_v12  ;;  %v125_v19 = vld [vmem:[#allocation9 + $0x60] sm:$0xff]  ;;  %v114_v22 = vld [vmem:[#allocation9 + $0x30] sm:$0xf]  ;;  %p1869_p4 = pnand %p1867_p3, %p1864_p2 }
  0x2c   :  { %75 = vst.msk [vmem:[#allocation2 + $0xf] sm:$0xff] %vm67_vm0, %v1384_v13  ;;  %1605 = vmatpush3.bf16.msra.mxu1 %v1602_v10  ;;  %v1606_v17 = vpack.c.bf16 %v123_v16, %v122_v14  ;;  %v1610_v20 = vpack.c.bf16 %v125_v19, %v124_v18  ;;  %v1385_v21 = vld [vmem:[%s2157_s0 + $0x30] ss:$2 sm:$0x7f]  ;;  %v1386_v23 = vld [vmem:[%s2157_s0 + $0x1] ss:$2 sm:$0xff] }
  0x2d   :  { %76 = vst.msk [vmem:[#allocation2 + $0x17] sm:$0x7f] %vm69_vm1, %v1385_v21  ;;  %v1390_v24 = vld [vmem:[%s2157_s0 + $0x2] ss:$2 sm:$0xff]  ;;  %v1388_v27 = vld [vmem:[%s2157_s0 + $0x21] ss:$2 sm:$0xff] }
  0x2e   :  { %1621 = vmatpush3.bf16.msra.mxu0 %v1618_v6  ;;  %1607 = vmatprep.subr.bf16.mxu1 %v1606_v17  ;;  %v333_v25 = vld [vmem:[#allocation9 + $0x70] sm:$0xff]  ;;  %81 = vst.msk [vmem:[#allocation2 + $0x1e] sm:$0xff] %vm67_vm0, %v1386_v23  ;;  %93 = vst.msk [vmem:[#allocation2 + $0x3c] sm:$0xff] %vm67_vm0, %v1390_v24  ;;  %v334_v28 = vld [vmem:[#allocation9 + $0x78] sm:$0xff] }
  0x2f   :  { %1623 = vmatprep.subr.bf16.mxu0 %v1622_v15  ;;  %v1387_v26 = vld [vmem:[%s2157_s0 + $0x11] ss:$2 sm:$0x7f]  ;;  %87 = vst.msk [vmem:[#allocation2 + $0x2d] sm:$0xff] %vm67_vm0, %v1388_v27  ;;  %v1392_v30 = vld [vmem:[%s2157_s0 + $0x22] ss:$2 sm:$0xff]  ;;  %v1626_v37 = vpack.c.bf16 %v334_v28, %v333_v25 }
  0x30   :  { %1609 = vmatpush3.bf16.msra.mxu1 %v1606_v17  ;;  %82 = vst.msk [vmem:[#allocation2 + $0x26] sm:$0x7f] %vm69_vm1, %v1387_v26  ;;  %v1391_v29 = vld [vmem:[%s2157_s0 + $0x12] ss:$2 sm:$0x7f]  ;;  %v335_v32 = vld [vmem:[#allocation9 + $0x80] sm:$0xff] }
  0x31   :  { %v104_v31 = vld [vmem:[#allocation2] sm:$0xff]  ;;  %1611 = vmatprep.subr.bf16.mxu1 %v1610_v20  ;;  %94 = vst.msk [vmem:[#allocation2 + $0x44] sm:$0x7f] %vm69_vm1, %v1391_v29  ;;  %v1389_v33 = vld [vmem:[%s2157_s0 + $0x31] ss:$2 sm:$0x7f] }
  0x32   :  { %99 = vst.msk [vmem:[#allocation2 + $0x4b] sm:$0xff] %vm67_vm0, %v1392_v30  ;;  %1625 = vmatpush3.bf16.msra.mxu0 %v1622_v15  ;;  %1519 = vmatprep.mubr.msk.f32.mxu0 %vm67_vm0, %v104_v31  ;;  %v336_v34 = vld [vmem:[#allocation9 + $0x88] sm:$0xff]  ;;  %v1393_v36 = vld [vmem:[%s2157_s0 + $0x32] ss:$2 sm:$0x7f]  ;;  %v563_v58 = vld [vmem:[#allocation12 + $0x58] sm:$0xff] }
  0x33   :  { %v126_v35 = vld [vmem:[#allocation9 + $0x68] sm:$0xf]  ;;  %88 = vst.msk [vmem:[#allocation2 + $0x35] sm:$0x7f] %vm69_vm1, %v1389_v33  ;;  %1517 = vmatprep.subr.msk.mxu0 %vm139_vm2, %v114_v22  ;;  %100 = vst.msk [vmem:[#allocation2 + $0x53] sm:$0x7f] %vm69_vm1, %v1393_v36  ;;  %v1630_v39 = vpack.c.bf16 %v336_v34, %v335_v32 }
  0x34   :  { %v105_v38 = vld [vmem:[#allocation2 + $0x8] sm:$0xff]  ;;  %1613 = vmatpush3.bf16.msra.mxu1 %v1610_v20  ;;  %v106_v40 = vld [vmem:[#allocation2 + $0x10] sm:$0xff]  ;;  %v338_v42 = vld [vmem:[#allocation9 + $0x98] sm:$0xff] }
  0x35   :  { %1497 = vmatprep.subr.msk.mxu1 %vm139_vm2, %v126_v35  ;;  %v337_v41 = vld [vmem:[#allocation9 + $0x90] sm:$0xff]  ;;  %v115_v43 = vld [vmem:[#allocation2 + $0x1e] sm:$0xff]  ;;  %v107_v44 = vld [vmem:[#allocation2 + $0x18] sm:$0x3f] }
  0x36   :  { %1518 = vmatpush3.msk.msra.mxu0 %vm139_vm2, %v114_v22  ;;  %v1634_v46 = vpack.c.bf16 %v338_v42, %v337_v41  ;;  %v328_v47 = vld [vmem:[#allocation2 + $0x3c] sm:$0xff]  ;;  %1499 = vmatprep.mubr.msk.f32.mxu1 %vm67_vm0, %v115_v43  ;;  %v560_v54 = vld [vmem:[#allocation12 + $0x40] sm:$0xff]  ;;  %v561_v55 = vld [vmem:[#allocation12 + $0x48] sm:$0xff] }
  0x37   :  { %1627 = vmatprep.subr.bf16.mxu0 %v1626_v37  ;;  %1520 = vmatmul.mubr.msk.f32.vlgmr.msra.gmra.mrb[0].mxu0 %vm67_vm0, %v105_v38  ;;  %v116_v45 = vld [vmem:[#allocation2 + $0x26] sm:$0xff]  ;;  %v339_v50 = vld [vmem:[#allocation9 + $0xa0] sm:$0xf]  ;;  %v1638_v56 = vpack.c.bf16 %v561_v55, %v560_v54  ;;  %v562_v57 = vld [vmem:[#allocation12 + $0x50] sm:$0xff] }
  0x38   :  { %1629 = vmatpush3.bf16.msra.mxu0 %v1626_v37  ;;  %1522 = vmatprep.mubr.msk.f32.mxu0 %vm67_vm0, %v106_v40  ;;  %v564_v59 = vld [vmem:[#allocation12 + $0x60] sm:$0xff]  ;;  %v1642_v60 = vpack.c.bf16 %v563_v58, %v562_v57  ;;  %v565_v61 = vld [vmem:[#allocation12 + $0x68] sm:$0xff]  ;;  %v566_v63 = vld [vmem:[#allocation12 + $0x70] sm:$0xff] }
  0x39   :  { %1631 = vmatprep.subr.bf16.mxu0 %v1630_v39  ;;  %1498 = vmatpush3.msk.msra.mxu1 %vm139_vm2, %v126_v35  ;;  %v329_v51 = vld [vmem:[#allocation2 + $0x44] sm:$0xff]  ;;  %v1646_v62 = vpack.c.bf16 %v565_v61, %v564_v59  ;;  %v550_v3 = vld [vmem:[#allocation12 + $0x8] sm:$0xff]  ;;  %v1409_v9 = vld [vmem:[%s2161_s4] ss:$0 sm:$0xff] }
  0x3a   :  { %v117_v48 = vld [vmem:[#allocation2 + $0x2e] sm:$0xff]  ;;  %1500 = vmatmul.mubr.msk.f32.vlgmr.msra.gmra.mrb[0].mxu1 %vm67_vm0, %v116_v45  ;;  %v118_v49 = vld [vmem:[#allocation2 + $0x36] sm:$0x3f]  ;;  %1639 = vmatprep.subr.bf16.mxu1 %v1638_v56  ;;  %v567_v0 = vld [vmem:[#allocation12 + $0x78] sm:$0xff] }
  0x3b   :  { %1523 = vmatmul.mubr.msk.f32.gmra.mrb[2].mxu0 %vm67_vm0, %v107_v44  ;;  %1502 = vmatprep.mubr.msk.f32.mxu1 %vm67_vm0, %v117_v48  ;;  %v330_v52 = vld [vmem:[#allocation2 + $0x4c] sm:$0xff]  ;;  %v331_v53 = vld [vmem:[#allocation2 + $0x54] sm:$0x3f]  ;;  %v1650_v1 = vpack.c.bf16 %v567_v0, %v566_v63 }
  0x3c   :  { %1633 = vmatpush3.bf16.msra.mxu0 %v1630_v39  ;;  %1539 = vmatprep.mubr.msk.f32.mxu0 %vm67_vm0, %v328_v47  ;;  %v549_v2 = vld [vmem:[#allocation12] sm:$0xff] }
  0x3d   :  { %1635 = vmatprep.subr.bf16.mxu0 %v1634_v46  ;;  %1641 = vmatpush3.bf16.msra.mxu1 %v1638_v56  ;;  %v2054_v4 = vpack.c.bf16 %v550_v3, %v549_v2  ;;  %v506_v3 = vlaneseq }
  0x3e   :  { %1503 = vmatmul.mubr.msk.f32.gmra.mrb[2].mxu1 %vm67_vm0, %v118_v49  ;;  %1643 = vmatprep.subr.bf16.mxu1 %v1642_v60 }
  0x40   :  { %1637 = vmatpush3.bf16.msra.mxu0 %v1634_v46 }
  0x41   :  { %1537 = vmatprep.subr.msk.mxu0 %vm139_vm2, %v339_v50  ;;  %1645 = vmatpush3.bf16.msra.mxu1 %v1642_v60 }
  0x42   :  { %1647 = vmatprep.subr.bf16.mxu1 %v1646_v62 }
  0x44   :  { %1538 = vmatpush3.msk.msra.mxu0 %vm139_vm2, %v339_v50 }
  0x45   :  { %1540 = vmatmul.mubr.msk.f32.vlgmr.msra.gmra.mrb[0].mxu0 %vm67_vm0, %v329_v51  ;;  %1649 = vmatpush3.bf16.msra.mxu1 %v1646_v62 }
  0x46   :  { %1542 = vmatprep.mubr.msk.f32.mxu0 %vm67_vm0, %v330_v52  ;;  %1651 = vmatprep.subr.bf16.mxu1 %v1650_v1 }
  0x49   :  { %1543 = vmatmul.mubr.msk.f32.gmra.mrb[2].mxu0 %vm67_vm0, %v331_v53  ;;  %1653 = vmatpush3.bf16.msra.mxu1 %v1650_v1 }
  0x4a   :  { %1655 = vmatprep.subr.bf16.mxu1 %v2054_v4 }
 0x10d   :  { %v1501_v5 = vpop.f32.mrb[0].mxu1 }
 0x10e   :  { %v209_v6 = vpop.f32.mrb[1].mxu1 }
 0x111   :  { %v1504_v7 = vpop.f32.mrb[2].mxu1 }
 0x112   :  { %v219_v8 = vpop.f32.mrb[3].mxu1 }
 0x118   :  { %v1541_v10 = vpop.f32.mrb[0].mxu0 }
 0x119   :  { %v1782_v11 = vadd.f32 %v1541_v10, %v1501_v5  ;;  %v421_v12 = vpop.f32.mrb[1].mxu0  ;;  %v2068_v5 = vshrl.u32 %v506_v3, 7 }
 0x11a   :  { %v1783_v13 = vadd.f32 %v421_v12, %v209_v6  ;;  %v102_v6 = vld [vmem:[%s2161_s4 + $0x1] sm:$0x1] }
 0x11b   :  { %v449_v14 = vadd.f32 %v1782_v11, %v1409_v9  ;;  %v1410_v11 = vld [vmem:[%s2161_s4 + $0x2] ss:$0 sm:$0xff]  ;;  %s1919_s4 = smov [#allocation7]  }
 0x11c   :  { %v448_v15 = vadd.f32 %v1783_v13, %v1409_v9  ;;  %v1544_v16 = vpop.f32.mrb[2].mxu0  ;;  %s60_s29 = sshll.u32 %s1919_s4, 4  ;;  %s61_s29 = int_to_ptr.vmem [resolvable:$true] %s60_s29 }
 0x11d   :  { %vm453_vm3 = vcmp.gt.f32.partialorder %v449_v14, 0.0  ;;  %v457_v17 = vmul.f32 0.01, %v449_v14  ;;  %v1784_v18 = vadd.f32 %v1544_v16, %v1504_v7  ;;  %v431_v19 = vpop.f32.mrb[3].mxu0  ;;  %v2074_v7 = vsub.s32 0, %v2068_v5 }
 0x11e   :  { %vm452_vm5 = vcmp.gt.f32.partialorder %v448_v15, 0.0  ;;  %v456_v20 = vmul.f32 0.01, %v448_v15  ;;  %v1785_v21 = vadd.f32 %v431_v19, %v219_v8 }
 0x11f   :  { %v461_v22 = vsel %vm453_vm3, %v449_v14, %v457_v17  ;;  %v451_v23 = vadd.f32 %v1784_v18, %v1409_v9 }
 0x120   :  { %v466_v24 = vsel %vm464_vm4, %v461_v22, 0.0  ;;  %v460_v25 = vsel %vm452_vm5, %v448_v15, %v456_v20  ;;  %v450_v26 = vadd.f32 %v1785_v21, %v1409_v9 }
 0x121   :  { %v465_v27 = vsel %vm464_vm4, %v460_v25, 0.0  ;;  %vm455_vm6 = vcmp.gt.f32.partialorder %v451_v23, 0.0  ;;  %v459_v28 = vmul.f32 0.01, %v451_v23 }
 0x122   :  { %v467_v29 = vadd.f32 %v466_v24, %v465_v27  ;;  %vm454_vm7 = vcmp.gt.f32.partialorder %v450_v26, 0.0  ;;  %v458_v30 = vmul.f32 0.01, %v450_v26  ;;  %v552_v27 = vld [vmem:[#allocation12 + $0x18] sm:$0xff] }
 0x123   :  { %v463_v31 = vsel %vm455_vm6, %v451_v23, %v459_v28 }
 0x124   :  { %v462_v32 = vsel %vm454_vm7, %v450_v26, %v458_v30  ;;  %v471_v35 = vsel %vm470_vm8, %v463_v31, 0.0  ;;  %v551_v26 = vld [vmem:[#allocation12 + $0x10] sm:$0xff] }
 0x125   :  { %v468_v33 = vsel %vm464_vm4, %v462_v32, 0.0  ;;  %v1658_v30 = vpack.c.bf16 %v552_v27, %v551_v26 }
 0x126   :  { %v469_v34 = vadd.f32 %v468_v33, %v467_v29 }
 0x128   :  { %v472_v36 = vadd.f32 %v471_v35, %v469_v34  ;;  %v555_v35 = vld [vmem:[#allocation12 + $0x30] sm:$0xff] }
 0x12a   :  { %v473_v37 = vrot.slane %v472_v36, 4 }
 0x12c   :  { %v474_v38 = vadd.f32 %v473_v37, %v472_v36  ;;  %v556_v36 = vld [vmem:[#allocation12 + $0x38] sm:$0xff] }
 0x12d   :  { %v1666_v37 = vpack.c.bf16 %v556_v36, %v555_v35 }
 0x12e   :  { %v475_v39 = vrot.slane %v474_v38, 2 }
 0x130   :  { %v476_v40 = vadd.f32 %v475_v39, %v474_v38  ;;  %v733_v38 = vld [vmem:[#allocation12 + $0x80] sm:$0xff]  ;;  %v734_v39 = vld [vmem:[#allocation12 + $0x88] sm:$0xff] }
 0x132   :  { %v477_v41 = vrot.slane %v476_v40, 1 }
 0x134   :  { %v478_v42 = vadd.f32 %v477_v41, %v476_v40  ;;  %v1670_v40 = vpack.c.bf16 %v734_v39, %v733_v38  ;;  %v735_v41 = vld [vmem:[#allocation12 + $0x90] sm:$0xff] }
 0x136   :  { %v480_v43 = vmul.f32 0.033333335, %v478_v42  ;;  %v736_v42 = vld [vmem:[#allocation12 + $0x98] sm:$0xff] }
 0x138   :  { %v481_v44 = vsub.f32 %v460_v25, %v480_v43  ;;  %v482_v45 = vsub.f32 %v461_v22, %v480_v43  ;;  %v483_v46 = vsub.f32 %v462_v32, %v480_v43  ;;  %v484_v47 = vsub.f32 %v463_v31, %v480_v43  ;;  %v553_v31 = vld [vmem:[#allocation12 + $0x20] sm:$0xff]  ;;  %v554_v32 = vld [vmem:[#allocation12 + $0x28] sm:$0xff] }
 0x139   :  { %v1662_v34 = vpack.c.bf16 %v554_v32, %v553_v31  ;;  %v1674_v43 = vpack.c.bf16 %v736_v42, %v735_v41 }
 0x13a   :  { %v485_v48 = vmul.f32 %v481_v44, %v481_v44  ;;  %v486_v49 = vmul.f32 %v482_v45, %v482_v45  ;;  %v487_v50 = vmul.f32 %v483_v46, %v483_v46  ;;  %v488_v51 = vmul.f32 %v484_v47, %v484_v47 }
 0x13c   :  { %v489_v52 = vsel %vm464_vm4, %v485_v48, 0.0  ;;  %v490_v53 = vsel %vm464_vm4, %v486_v49, 0.0  ;;  %v492_v55 = vsel %vm464_vm4, %v487_v50, 0.0  ;;  %v494_v57 = vsel %vm470_vm8, %v488_v51, 0.0  ;;  %v739_v48 = vld [vmem:[#allocation12 + $0xb0] sm:$0xff]  ;;  %v740_v49 = vld [vmem:[#allocation12 + $0xb8] sm:$0xff] }
 0x13d   :  { %v491_v54 = vadd.f32 %v490_v53, %v489_v52  ;;  %v1682_v50 = vpack.c.bf16 %v740_v49, %v739_v48 }
 0x13f   :  { %v493_v56 = vadd.f32 %v492_v55, %v491_v54 }
 0x141   :  { %v495_v58 = vadd.f32 %v494_v57, %v493_v56 }
 0x143   :  { %v496_v59 = vrot.slane %v495_v58, 4 }
 0x145   :  { %v497_v60 = vadd.f32 %v496_v59, %v495_v58 }
 0x147   :  { %v498_v61 = vrot.slane %v497_v60, 2 }
 0x149   :  { %v499_v62 = vadd.f32 %v498_v61, %v497_v60 }
 0x14b   :  { %v500_v63 = vrot.slane %v499_v62, 1 }
 0x14d   :  { %v501_v0 = vadd.f32 %v500_v63, %v499_v62 }
 0x14f   :  { %v502_v1 = vmul.f32 0.033333335, %v501_v0 }
 0x151   :  { %v503_v2 = vadd.f32 1e-05, %v502_v1 }
 0x153   :  { %1811 = vrsqrt.f32 %v503_v2 }
 0x15d   :  { %v1812_v8 = vpop.eup %1811 }
 0x15e   :  { %v505_v9 = vmul.f32 %v1812_v8, %v102_v6 }
 0x160   :  { %v509_v10 = vrot.slane %v505_v9, %v2074_v7 }
 0x162   :  { %v510_v12 = vmul.f32 %v509_v10, %v481_v44  ;;  %v511_v13 = vmul.f32 %v509_v10, %v482_v45  ;;  %v512_v14 = vmul.f32 %v509_v10, %v483_v46  ;;  %v513_v15 = vmul.f32 %v509_v10, %v484_v47  ;;  %v737_v44 = vld [vmem:[#allocation12 + $0xa0] sm:$0xff]  ;;  %v738_v45 = vld [vmem:[#allocation12 + $0xa8] sm:$0xff] }
 0x163   :  { %v1678_v47 = vpack.c.bf16 %v738_v45, %v737_v44 }
 0x164   :  { %v518_v16 = vadd.f32 %v1410_v11, %v510_v12  ;;  %v519_v17 = vadd.f32 %v1410_v11, %v511_v13  ;;  %v520_v18 = vadd.f32 %v1410_v11, %v512_v14  ;;  %v521_v19 = vadd.f32 %v1410_v11, %v513_v15 }
 0x166   :  { %522 = vst.msk [vmem:[#allocation5] sm:$0xff] %vm464_vm4, %v518_v16  ;;  %523 = vst.msk [vmem:[#allocation5 + $0x8] sm:$0xff] %vm464_vm4, %v519_v17 }
 0x167   :  { %524 = vst.msk [vmem:[#allocation5 + $0x10] sm:$0xff] %vm464_vm4, %v520_v18 }
 0x168   :  { %525 = vst.msk [vmem:[#allocation5 + $0x18] sm:$0x3f] %vm470_vm8, %v521_v19 }
 0x16d   :  { %v533_v20 = vld [vmem:[#allocation5 + $0x1] ss:$2 sm:$0x7f]  ;;  %v526_v22 = vld [vmem:[#allocation5] ss:$2 sm:$0x7f] }
 0x16e   :  { %534 = vst.msk [vmem:[#allocation3 + $0xe] sm:$0x7f] %vm527_vm9, %v533_v20  ;;  %528 = vst.msk [vmem:[#allocation3] sm:$0x7f] %vm527_vm9, %v526_v22 }
 0x16f   :  { %v536_v21 = vld [vmem:[#allocation5 + $0x10] ss:$2 sm:$0x7f]  ;;  %v530_v23 = vld [vmem:[#allocation5 + $0xf] ss:$2 sm:$0x7f] }
 0x170   :  { %537 = vst.msk [vmem:[#allocation3 + $0x15] sm:$0x7f] %vm527_vm9, %v536_v21  ;;  %531 = vst.msk [vmem:[#allocation3 + $0x7] sm:$0x7f] %vm527_vm9, %v530_v23 }
 0x171   :  { %v539_v24 = vld [vmem:[#allocation5 + $0x2] ss:$2 sm:$0x7f]  ;;  %v542_v25 = vld [vmem:[#allocation5 + $0x11] ss:$2 sm:$0x7f] }
 0x172   :  { %540 = vst.msk [vmem:[#allocation3 + $0x1c] sm:$0x7f] %vm527_vm9, %v539_v24  ;;  %543 = vst.msk [vmem:[#allocation3 + $0x23] sm:$0x7f] %vm527_vm9, %v542_v25 }
 0x177   :  { %v557_v28 = vld [vmem:[#allocation3 + $0xe] sm:$0xff]  ;;  %v558_v29 = vld [vmem:[#allocation3 + $0x16] sm:$0x3f]  ;;  %v547_v33 = vld [vmem:[#allocation3] sm:$0xff] }
 0x178   :  { %1561 = vmatprep.mubr.msk.f32.mxu1 %vm464_vm4, %v557_v28 }
 0x179   :  { %1562 = vmatmul.mubr.msk.f32.vlgmr.msra.gmra.mrb[4].mxu1 %vm464_vm4, %v558_v29  ;;  %v730_v46 = vld [vmem:[#allocation3 + $0x1c] sm:$0xff]  ;;  %v731_v51 = vld [vmem:[#allocation3 + $0x24] sm:$0x3f] }
 0x17a   :  { %1657 = vmatpush3.bf16.msra.mxu1 %v2054_v4  ;;  %1580 = vmatprep.mubr.msk.f32.mxu1 %vm464_vm4, %v547_v33  ;;  %v548_v4 = vld [vmem:[#allocation3 + $0x8] sm:$0x3f] }
 0x17b   :  { %1659 = vmatprep.subr.bf16.mxu1 %v1658_v30 }
 0x17e   :  { %1661 = vmatpush3.bf16.msra.mxu1 %v1658_v30 }
 0x17f   :  { %1663 = vmatprep.subr.bf16.mxu1 %v1662_v34 }
 0x182   :  { %1665 = vmatpush3.bf16.msra.mxu1 %v1662_v34 }
 0x183   :  { %1667 = vmatprep.subr.bf16.mxu1 %v1666_v37 }
 0x186   :  { %1669 = vmatpush3.bf16.msra.mxu1 %v1666_v37 }
 0x187   :  { %1671 = vmatprep.subr.bf16.mxu1 %v1670_v40 }
 0x189   :  { %1581 = vmatmul.mubr.msk.f32.vlgmr.msra.gmra.mrb[4].mxu1 %vm464_vm4, %v548_v4 }
 0x18a   :  { %1673 = vmatpush3.bf16.msra.mxu1 %v1670_v40  ;;  %1599 = vmatprep.mubr.msk.f32.mxu1 %vm464_vm4, %v730_v46 }
 0x18b   :  { %1675 = vmatprep.subr.bf16.mxu1 %v1674_v43 }
 0x18e   :  { %1677 = vmatpush3.bf16.msra.mxu1 %v1674_v43 }
 0x18f   :  { %1679 = vmatprep.subr.bf16.mxu1 %v1678_v47 }
 0x192   :  { %1681 = vmatpush3.bf16.msra.mxu1 %v1678_v47 }
 0x193   :  { %1683 = vmatprep.subr.bf16.mxu1 %v1682_v50 }
 0x196   :  { %1685 = vmatpush3.bf16.msra.mxu1 %v1682_v50 }
 0x199   :  { %1600 = vmatmul.mubr.msk.f32.vlgmr.msra.gmra.mrb[4].mxu1 %vm464_vm4, %v731_v51 }
 0x19a   :  { %1872 = shalt.err (!%p1869_p4)  }
 0x19b   :  { %s1873_s14 = scalar_lea.vmem %s61_s29, 12288  ;;  %p1878_p6 = scmp.lt.s32.totalorder %s61_s29, %s61_s29 }
 0x19c   :  { %p1874_p5 = scmp.ne.s32.totalorder %s61_s29, %s1873_s14  ;;  %p1879_p7 = scmp.lt.s32.totalorder %s1873_s14, %s1873_s14 }
 0x19e   :  { %p1880_p8 = por %p1879_p7, %p1878_p6 }
 0x1a0   :  { %p1881_p9 = pnand %p1880_p8, %p1874_p5 }
 0x1a2   :  { %1884 = shalt.err (!%p1881_p9)  }
 0x1a3   :  { %63 = dma.hbm_to_vmem [thread:$0]  %s2160_s3, 12288, %s61_s29, [#allocation8]  ;;  %v1417_v52 = vld [vmem:[%s2162_s5] ss:$0 sm:$0xff]  ;;  %vm836_vm11 = vcmask 1045504  }
 0x1a4   :  { %v545_v23 = vld [vmem:[%s2162_s5 + $0x1] sm:$0x1]  ;;  %v1418_v27 = vld [vmem:[%s2162_s5 + $0x2] ss:$0 sm:$0xff] }
 0x26c   :  { %v1601_v53 = vpop.f32.mrb[4].mxu1 }
 0x26d   :  { %v829_v54 = vadd.f32 %v1601_v53, %v1417_v52  ;;  %v813_v55 = vpop.f32.mrb[5].mxu1 }
 0x26e   :  { %v828_v56 = vadd.f32 %v1417_v52, %v813_v55 }
 0x26f   :  { %vm831_vm10 = vcmp.gt.f32.partialorder %v829_v54, 0.0  ;;  %v833_v57 = vmul.f32 0.01, %v829_v54 }
 0x270   :  { %vm830_vm12 = vcmp.gt.f32.partialorder %v828_v56, 0.0  ;;  %v832_v58 = vmul.f32 0.01, %v828_v56 }
 0x271   :  { %v835_v59 = vsel %vm831_vm10, %v829_v54, %v833_v57 }
 0x272   :  { %v837_v60 = vsel %vm836_vm11, %v835_v59, 0.0  ;;  %v834_v61 = vsel %vm830_vm12, %v828_v56, %v832_v58 }
 0x273   :  { %v838_v62 = vadd.f32 %v837_v60, %v834_v61 }
 0x275   :  { %v839_v63 = vrot.slane %v838_v62, 4 }
 0x277   :  { %v840_v0 = vadd.f32 %v839_v63, %v838_v62 }
 0x279   :  { %v841_v1 = vrot.slane %v840_v0, 2 }
 0x27b   :  { %v842_v2 = vadd.f32 %v841_v1, %v840_v0 }
 0x27d   :  { %v843_v3 = vrot.slane %v842_v2, 1 }
 0x27f   :  { %v844_v6 = vadd.f32 %v843_v3, %v842_v2 }
 0x281   :  { %v846_v8 = vmul.f32 0.071428575, %v844_v6 }
 0x283   :  { %v847_v9 = vsub.f32 %v834_v61, %v846_v8  ;;  %v848_v10 = vsub.f32 %v835_v59, %v846_v8 }
 0x285   :  { %v849_v11 = vmul.f32 %v847_v9, %v847_v9  ;;  %v850_v12 = vmul.f32 %v848_v10, %v848_v10 }
 0x287   :  { %v851_v13 = vsel %vm836_vm11, %v850_v12, 0.0 }
 0x288   :  { %v852_v14 = vadd.f32 %v851_v13, %v849_v11 }
 0x28a   :  { %v853_v15 = vrot.slane %v852_v14, 4 }
 0x28c   :  { %v854_v16 = vadd.f32 %v853_v15, %v852_v14 }
 0x28e   :  { %v855_v17 = vrot.slane %v854_v16, 2 }
 0x290   :  { %v856_v18 = vadd.f32 %v855_v17, %v854_v16 }
 0x292   :  { %v857_v19 = vrot.slane %v856_v18, 1 }
 0x294   :  { %v858_v20 = vadd.f32 %v857_v19, %v856_v18 }
 0x296   :  { %v859_v21 = vmul.f32 0.071428575, %v858_v20 }
 0x298   :  { %v860_v22 = vadd.f32 1e-05, %v859_v21 }
 0x29a   :  { %1813 = vrsqrt.f32 %v860_v22 }
 0x2a4   :  { %v1814_v24 = vpop.eup %1813 }
 0x2a5   :  { %v862_v25 = vmul.f32 %v1814_v24, %v545_v23 }
 0x2a7   :  { %v866_v26 = vrot.slane %v862_v25, %v2074_v7 }
 0x2a9   :  { %v867_v28 = vmul.f32 %v866_v26, %v847_v9  ;;  %v868_v29 = vmul.f32 %v866_v26, %v848_v10 }
 0x2ab   :  { %v873_v30 = vadd.f32 %v1418_v27, %v867_v28  ;;  %v874_v31 = vadd.f32 %v1418_v27, %v868_v29 }
 0x2ad   :  { %875 = vst [vmem:[#allocation6] sm:$0xff] %v873_v30  ;;  %876 = vst [vmem:[#allocation6 + $0x8] sm:$0x3f] %v874_v31 }
 0x2b4   :  { %v877_v32 = vld [vmem:[#allocation6] sm:$0x1f]  ;;  %v879_v33 = vld [vmem:[#allocation6 + $0x7] sm:$0x1f] }
 0x2b5   :  { %v881_v34 = vld [vmem:[#allocation6 + $0x1] sm:$0x1f]  ;;  %878 = vst [vmem:[#allocation4] sm:$0x1f] %v877_v32  ;;  %880 = vst [vmem:[#allocation4 + $0x5] sm:$0x1f] %v879_v33 }
 0x2b6   :  { %882 = vst [vmem:[#allocation4 + $0xa] sm:$0x1f] %v881_v34  ;;  %v883_v35 = vld [vmem:[#allocation6 + $0x8] sm:$0x1f]  ;;  %v885_v36 = vld [vmem:[#allocation6 + $0x2] sm:$0x1f] }
 0x2b7   :  { %v887_v37 = vld [vmem:[#allocation6 + $0x9] sm:$0x1f]  ;;  %884 = vst [vmem:[#allocation4 + $0xf] sm:$0x1f] %v883_v35  ;;  %886 = vst [vmem:[#allocation4 + $0x14] sm:$0x1f] %v885_v36 }
 0x2b8   :  { %888 = vst [vmem:[#allocation4 + $0x19] sm:$0x1f] %v887_v37 }
 0x2b9   :  { %1911 = dma.done.wait [#allocation8], 12288 }
 0x2ba   :  { %1912 = vsyncadd [#allocation8], 4294955008  ;;  %v1920_v38 = vmov 0.0   ;;  %v902_v39 = vld [vmem:[#allocation7 + $0x8] sm:$0xff]  ;;  %v904_v40 = vld [vmem:[#allocation7 + $0x18] sm:$0xff]  ;;  %vm1265_vm13 = vcmask 1041408  }
 0x2bb   :  { %1109 = vmatprep.mubr.f32.mxu0 %v1920_v38  ;;  %1032 = vmatprep.mubr.f32.mxu1 %v1920_v38  ;;  %v901_v41 = vld [vmem:[#allocation7] sm:$0xff]  ;;  %v1718_v42 = vpack.c.bf16 %v904_v40, %v902_v39  ;;  %v903_v43 = vld [vmem:[#allocation7 + $0x10] sm:$0xff]  ;;  %v906_v4 = vld [vmem:[#allocation7 + $0x28] sm:$0xff]  ;;  %s1921_s25 = smov [#allocation14]  }
 0x2bc   :  { %v908_v44 = vld [vmem:[#allocation7 + $0x38] sm:$0xff]  ;;  %v1720_v45 = vpack.c.bf16 %v903_v43, %v901_v41  ;;  %v905_v47 = vld [vmem:[#allocation7 + $0x20] sm:$0xff]  ;;  %v907_v48 = vld [vmem:[#allocation7 + $0x30] sm:$0xff]  ;;  %s1364_s26 = sshll.u32 %s1921_s25, 4  ;;  %s1365_s26 = int_to_ptr.vmem [resolvable:$true] %s1364_s26 }
 0x2bd   :  { %v1722_v46 = vpack.c.bf16 %v908_v44, %v906_v4  ;;  %v910_v49 = vld [vmem:[#allocation7 + $0x48] sm:$0xff]  ;;  %1719 = vmatprep.subr.bf16.mxu0 %v1718_v42  ;;  %v912_v50 = vld [vmem:[#allocation7 + $0x58] sm:$0xff]  ;;  %v1724_v51 = vpack.c.bf16 %v907_v48, %v905_v47  ;;  %v909_v53 = vld [vmem:[#allocation7 + $0x40] sm:$0xff]  ;;  %p1890_p11 = scmp.lt.s32.totalorder %s1365_s26, %s1365_s26 }
 0x2be   :  { %1721 = vmatpush1.bf16.msra.mxu0 %v1720_v45  ;;  %v1726_v52 = vpack.c.bf16 %v912_v50, %v910_v49  ;;  %v911_v54 = vld [vmem:[#allocation7 + $0x50] sm:$0xff]  ;;  %v914_v55 = vld [vmem:[#allocation7 + $0x68] sm:$0xff]  ;;  %v916_v56 = vld [vmem:[#allocation7 + $0x78] sm:$0xff] }
 0x2bf   :  { %1723 = vmatprep.subr.bf16.mxu0 %v1722_v46  ;;  %v1728_v57 = vpack.c.bf16 %v911_v54, %v909_v53  ;;  %v1730_v58 = vpack.c.bf16 %v916_v56, %v914_v55  ;;  %v913_v59 = vld [vmem:[#allocation7 + $0x60] sm:$0xff]  ;;  %v915_v60 = vld [vmem:[#allocation7 + $0x70] sm:$0xff]  ;;  %v918_v61 = vld [vmem:[#allocation7 + $0x88] sm:$0xff] }
 0x2c0   :  { %v920_v62 = vld [vmem:[#allocation7 + $0x98] sm:$0xff]  ;;  %v937_v63 = vld [vmem:[#allocation7 + $0x108] sm:$0xff]  ;;  %v936_v1 = vld [vmem:[#allocation7 + $0x100] sm:$0xff]  ;;  %v1732_v3 = vpack.c.bf16 %v915_v60, %v913_v59 }
 0x2c1   :  { %v939_v0 = vld [vmem:[#allocation7 + $0x118] sm:$0xff]  ;;  %v938_v2 = vld [vmem:[#allocation7 + $0x110] sm:$0xff]  ;;  %v917_v6 = vld [vmem:[#allocation7 + $0x80] sm:$0xff]  ;;  %v1734_v11 = vpack.c.bf16 %v920_v62, %v918_v61 }
 0x2c2   :  { %1725 = vmatpush1.bf16.msra.mxu0 %v1724_v51  ;;  %v919_v8 = vld [vmem:[#allocation7 + $0x90] sm:$0xff]  ;;  %v1686_v9 = vpack.c.bf16 %v939_v0, %v937_v63  ;;  %v1688_v10 = vpack.c.bf16 %v938_v2, %v936_v1  ;;  %v922_v12 = vld [vmem:[#allocation7 + $0xa8] sm:$0xff]  ;;  %v924_v13 = vld [vmem:[#allocation7 + $0xb8] sm:$0xff] }
 0x2c3   :  { %1727 = vmatprep.subr.bf16.mxu0 %v1726_v52  ;;  %v941_v14 = vld [vmem:[#allocation7 + $0x128] sm:$0xff]  ;;  %v943_v15 = vld [vmem:[#allocation7 + $0x138] sm:$0xff]  ;;  %v940_v16 = vld [vmem:[#allocation7 + $0x120] sm:$0xff]  ;;  %v1736_v20 = vpack.c.bf16 %v919_v8, %v917_v6  ;;  %v1738_v24 = vpack.c.bf16 %v924_v13, %v922_v12 }
 0x2c4   :  { %1687 = vmatprep.subr.bf16.mxu1 %v1686_v9  ;;  %v942_v17 = vld [vmem:[#allocation7 + $0x130] sm:$0xff]  ;;  %v1690_v18 = vpack.c.bf16 %v943_v15, %v941_v14  ;;  %v921_v21 = vld [vmem:[#allocation7 + $0xa0] sm:$0xff]  ;;  %v945_v22 = vld [vmem:[#allocation7 + $0x148] sm:$0xff] }
 0x2c5   :  { %1689 = vmatpush1.bf16.msra.mxu1 %v1688_v10  ;;  %v1692_v19 = vpack.c.bf16 %v942_v17, %v940_v16  ;;  %v947_v23 = vld [vmem:[#allocation7 + $0x158] sm:$0xff]  ;;  %v923_v25 = vld [vmem:[#allocation7 + $0xb0] sm:$0xff]  ;;  %v944_v27 = vld [vmem:[#allocation7 + $0x140] sm:$0xff] }
 0x2c6   :  { %1729 = vmatpush1.bf16.msra.mxu0 %v1728_v57  ;;  %1691 = vmatprep.subr.bf16.mxu1 %v1690_v18  ;;  %v1694_v26 = vpack.c.bf16 %v947_v23, %v945_v22  ;;  %v946_v28 = vld [vmem:[#allocation7 + $0x150] sm:$0xff]  ;;  %v926_v29 = vld [vmem:[#allocation7 + $0xc8] sm:$0xff]  ;;  %v928_v30 = vld [vmem:[#allocation7 + $0xd8] sm:$0xff]  ;;  %v1740_v34 = vpack.c.bf16 %v923_v25, %v921_v21 }
 0x2c7   :  { %1731 = vmatprep.subr.bf16.mxu0 %v1730_v58  ;;  %v1696_v31 = vpack.c.bf16 %v946_v28, %v944_v27  ;;  %v949_v32 = vld [vmem:[#allocation7 + $0x168] sm:$0xff]  ;;  %v951_v33 = vld [vmem:[#allocation7 + $0x178] sm:$0xff]  ;;  %v948_v36 = vld [vmem:[#allocation7 + $0x160] sm:$0xff]  ;;  %v1742_v39 = vpack.c.bf16 %v928_v30, %v926_v29 }
 0x2c8   :  { %v1698_v35 = vpack.c.bf16 %v951_v33, %v949_v32  ;;  %v950_v37 = vld [vmem:[#allocation7 + $0x170] sm:$0xff]  ;;  %v925_v40 = vld [vmem:[#allocation7 + $0xc0] sm:$0xff]  ;;  %v953_v42 = vld [vmem:[#allocation7 + $0x188] sm:$0xff] }
 0x2c9   :  { %1693 = vmatpush1.bf16.msra.mxu1 %v1692_v19  ;;  %v927_v41 = vld [vmem:[#allocation7 + $0xd0] sm:$0xff]  ;;  %v930_v43 = vld [vmem:[#allocation7 + $0xe8] sm:$0xff]  ;;  %v932_v4 = vld [vmem:[#allocation7 + $0xf8] sm:$0xff]  ;;  %v1700_v45 = vpack.c.bf16 %v950_v37, %v948_v36 }
 0x2ca   :  { %1733 = vmatpush1.bf16.msra.mxu0 %v1732_v3  ;;  %1695 = vmatprep.subr.bf16.mxu1 %v1694_v26  ;;  %v955_v44 = vld [vmem:[#allocation7 + $0x198] sm:$0xff]  ;;  %v1744_v46 = vpack.c.bf16 %v927_v41, %v925_v40  ;;  %v929_v47 = vld [vmem:[#allocation7 + $0xe0] sm:$0xff]  ;;  %v954_v50 = vld [vmem:[#allocation7 + $0x190] sm:$0xff]  ;;  %v1746_v51 = vpack.c.bf16 %v932_v4, %v930_v43 }
 0x2cb   :  { %1735 = vmatprep.subr.bf16.mxu0 %v1734_v11  ;;  %v1702_v48 = vpack.c.bf16 %v955_v44, %v953_v42  ;;  %v952_v49 = vld [vmem:[#allocation7 + $0x180] sm:$0xff]  ;;  %v931_v52 = vld [vmem:[#allocation7 + $0xf0] sm:$0xff]  ;;  %v957_v53 = vld [vmem:[#allocation7 + $0x1a8] sm:$0xff] }
 0x2cc   :  { %v959_v54 = vld [vmem:[#allocation7 + $0x1b8] sm:$0xff]  ;;  %v1126_v55 = vld [vmem:[#allocation7 + $0x208] sm:$0xff]  ;;  %v1704_v57 = vpack.c.bf16 %v954_v50, %v952_v49  ;;  %v1748_v58 = vpack.c.bf16 %v931_v52, %v929_v47  ;;  %v1125_v59 = vld [vmem:[#allocation7 + $0x200] sm:$0xff] }
 0x2cd   :  { %1697 = vmatpush1.bf16.msra.mxu1 %v1696_v31  ;;  %v1128_v56 = vld [vmem:[#allocation7 + $0x218] sm:$0xff]  ;;  %v1706_v60 = vpack.c.bf16 %v959_v54, %v957_v53  ;;  %v956_v61 = vld [vmem:[#allocation7 + $0x1a0] sm:$0xff]  ;;  %v958_v62 = vld [vmem:[#allocation7 + $0x1b0] sm:$0xff] }
 0x2ce   :  { %1737 = vmatpush1.bf16.msra.mxu0 %v1736_v20  ;;  %1699 = vmatprep.subr.bf16.mxu1 %v1698_v35  ;;  %v1750_v63 = vpack.c.bf16 %v1128_v56, %v1126_v55  ;;  %v1127_v0 = vld [vmem:[#allocation7 + $0x210] sm:$0xff]  ;;  %v961_v1 = vld [vmem:[#allocation7 + $0x1c8] sm:$0xff]  ;;  %v963_v2 = vld [vmem:[#allocation7 + $0x1d8] sm:$0xff]  ;;  %v1708_v9 = vpack.c.bf16 %v958_v62, %v956_v61 }
 0x2cf   :  { %1739 = vmatprep.subr.bf16.mxu0 %v1738_v24  ;;  %v1130_v3 = vld [vmem:[#allocation7 + $0x228] sm:$0xff]  ;;  %v1132_v6 = vld [vmem:[#allocation7 + $0x238] sm:$0xff]  ;;  %v899_v8 = vld [vmem:[#allocation4] sm:$0xff]  ;;  %v1752_v10 = vpack.c.bf16 %v1127_v0, %v1125_v59  ;;  %v1710_v12 = vpack.c.bf16 %v963_v2, %v961_v1 }
 0x2d0   :  { %v1129_v11 = vld [vmem:[#allocation7 + $0x220] sm:$0xff]  ;;  %v962_v14 = vld [vmem:[#allocation7 + $0x1d0] sm:$0xff]  ;;  %v1754_v15 = vpack.c.bf16 %v1132_v6, %v1130_v3  ;;  %v965_v17 = vld [vmem:[#allocation7 + $0x1e8] sm:$0xff] }
 0x2d1   :  { %1701 = vmatpush1.bf16.msra.mxu1 %v1700_v45  ;;  %v960_v13 = vld [vmem:[#allocation7 + $0x1c0] sm:$0xff]  ;;  %v1131_v16 = vld [vmem:[#allocation7 + $0x230] sm:$0xff]  ;;  %v967_v18 = vld [vmem:[#allocation7 + $0x1f8] sm:$0xff] }
 0x2d2   :  { %1741 = vmatpush1.bf16.msra.mxu0 %v1740_v34  ;;  %1703 = vmatprep.subr.bf16.mxu1 %v1702_v48  ;;  %v1134_v19 = vld [vmem:[#allocation7 + $0x248] sm:$0xff]  ;;  %v1136_v20 = vld [vmem:[#allocation7 + $0x258] sm:$0xff]  ;;  %v1712_v21 = vpack.c.bf16 %v962_v14, %v960_v13  ;;  %v1756_v22 = vpack.c.bf16 %v1131_v16, %v1129_v11  ;;  %v1714_v23 = vpack.c.bf16 %v967_v18, %v965_v17  ;;  %v964_v24 = vld [vmem:[#allocation7 + $0x1e0] sm:$0xff] }
 0x2d3   :  { %1743 = vmatprep.subr.bf16.mxu0 %v1742_v39  ;;  %v966_v25 = vld [vmem:[#allocation7 + $0x1f0] sm:$0xff]  ;;  %v900_v26 = vld [vmem:[#allocation4 + $0x8] sm:$0x3]  ;;  %v1758_v27 = vpack.c.bf16 %v1136_v20, %v1134_v19  ;;  %v1133_v28 = vld [vmem:[#allocation7 + $0x240] sm:$0xff] }
 0x2d4   :  { %v1135_v29 = vld [vmem:[#allocation7 + $0x250] sm:$0xff]  ;;  %v1138_v30 = vld [vmem:[#allocation7 + $0x268] sm:$0xff]  ;;  %v1140_v31 = vld [vmem:[#allocation7 + $0x278] sm:$0xff]  ;;  %v1716_v32 = vpack.c.bf16 %v966_v25, %v964_v24 }
 0x2d5   :  { %1705 = vmatpush1.bf16.msra.mxu1 %v1704_v57  ;;  %v1760_v33 = vpack.c.bf16 %v1135_v29, %v1133_v28  ;;  %v1762_v34 = vpack.c.bf16 %v1140_v31, %v1138_v30  ;;  %v1137_v35 = vld [vmem:[#allocation7 + $0x260] sm:$0xff]  ;;  %v1139_v36 = vld [vmem:[#allocation7 + $0x270] sm:$0xff]  ;;  %v1142_v37 = vld [vmem:[#allocation7 + $0x288] sm:$0xff] }
 0x2d6   :  { %1745 = vmatpush1.bf16.msra.mxu0 %v1744_v46  ;;  %1707 = vmatprep.subr.bf16.mxu1 %v1706_v60  ;;  %v1144_v39 = vld [vmem:[#allocation7 + $0x298] sm:$0xff]  ;;  %v1764_v41 = vpack.c.bf16 %v1139_v36, %v1137_v35  ;;  %v1141_v43 = vld [vmem:[#allocation7 + $0x280] sm:$0xff]  ;;  %v1143_v4 = vld [vmem:[#allocation7 + $0x290] sm:$0xff] }
 0x2d7   :  { %1747 = vmatprep.subr.bf16.mxu0 %v1746_v51  ;;  %v933_v40 = vld [vmem:[#allocation4 + $0xa] sm:$0xff]  ;;  %v1766_v42 = vpack.c.bf16 %v1144_v39, %v1142_v37  ;;  %v1146_v44 = vld [vmem:[#allocation7 + $0x2a8] sm:$0xff]  ;;  %v934_v46 = vld [vmem:[#allocation4 + $0x12] sm:$0x3]  ;;  %v1768_v47 = vpack.c.bf16 %v1143_v4, %v1141_v43 }
 0x2d8   :  { %v1148_v45 = vld [vmem:[#allocation7 + $0x2b8] sm:$0xff]  ;;  %v1145_v49 = vld [vmem:[#allocation7 + $0x2a0] sm:$0xff]  ;;  %v1147_v50 = vld [vmem:[#allocation7 + $0x2b0] sm:$0xff] }
 0x2d9   :  { %1709 = vmatpush1.bf16.msra.mxu1 %v1708_v9  ;;  %v1770_v48 = vpack.c.bf16 %v1148_v45, %v1146_v44  ;;  %v1150_v51 = vld [vmem:[#allocation7 + $0x2c8] sm:$0xff]  ;;  %v1152_v52 = vld [vmem:[#allocation7 + $0x2d8] sm:$0xff]  ;;  %v1772_v53 = vpack.c.bf16 %v1147_v50, %v1145_v49  ;;  %v1149_v55 = vld [vmem:[#allocation7 + $0x2c0] sm:$0xff] }
 0x2da   :  { %1749 = vmatpush1.bf16.msra.mxu0 %v1748_v58  ;;  %1711 = vmatprep.subr.bf16.mxu1 %v1710_v12  ;;  %v1774_v54 = vpack.c.bf16 %v1152_v52, %v1150_v51  ;;  %v1151_v56 = vld [vmem:[#allocation7 + $0x2d0] sm:$0xff]  ;;  %v1154_v57 = vld [vmem:[#allocation7 + $0x2e8] sm:$0xff]  ;;  %v1156_v58 = vld [vmem:[#allocation7 + $0x2f8] sm:$0xff] }
 0x2db   :  { %1751 = vmatprep.subr.bf16.mxu0 %v1750_v63  ;;  %v1776_v59 = vpack.c.bf16 %v1151_v56, %v1149_v55  ;;  %v1778_v60 = vpack.c.bf16 %v1156_v58, %v1154_v57  ;;  %v1153_v61 = vld [vmem:[#allocation7 + $0x2e0] sm:$0xff]  ;;  %v1155_v62 = vld [vmem:[#allocation7 + $0x2f0] sm:$0xff]  ;;  %v1123_v1 = vld [vmem:[#allocation4 + $0x1c] sm:$0x3] }
 0x2dc   :  { %v1780_v63 = vpack.c.bf16 %v1155_v62, %v1153_v61  ;;  %v1122_v0 = vld [vmem:[#allocation4 + $0x14] sm:$0xff] }
 0x2dd   :  { %1110 = vmatmul.mubr.f32.vlgmr.msra.gmra.mrb[4].mxu0 %v899_v8  ;;  %1713 = vmatpush1.bf16.msra.mxu1 %v1712_v21  ;;  %v894_v9 = vld [vmem:[%s2163_s6] ss:$4 sm:$0x3] }
 0x2de   :  { %1753 = vmatpush1.bf16.msra.mxu0 %v1752_v10  ;;  %1115 = vmatprep.mubr.f32.mxu0 %v1920_v38  ;;  %v2125_v10 = vsub.s32 1, %v2068_v5  ;;  %v1242_v12 = vrot.slane %v894_v9, %v2074_v7 }
 0x2df   :  { %1755 = vmatprep.subr.bf16.mxu0 %v1754_v15  ;;  %1715 = vmatprep.subr.bf16.mxu1 %v1714_v23 }
 0x2e1   :  { %1116 = vmatmul.mubr.f32.gmra.mrb[6].mxu0 %v900_v26  ;;  %1717 = vmatpush1.bf16.msra.mxu1 %v1716_v32 }
 0x2e2   :  { %1757 = vmatpush1.bf16.msra.mxu0 %v1756_v22  ;;  %1221 = vmatprep.mubr.f32.mxu0 %v1920_v38 }
 0x2e3   :  { %1759 = vmatprep.subr.bf16.mxu0 %v1758_v27 }
 0x2e4   :  { %1033 = vmatmul.mubr.f32.vlgmr.msra.gmra.mrb[6].mxu1 %v933_v40 }
 0x2e5   :  { %1038 = vmatprep.mubr.f32.mxu1 %v1920_v38 }
 0x2e6   :  { %1761 = vmatpush1.bf16.msra.mxu0 %v1760_v33 }
 0x2e7   :  { %1763 = vmatprep.subr.bf16.mxu0 %v1762_v34 }
 0x2e8   :  { %1039 = vmatmul.mubr.f32.gmra.mrb[8].mxu1 %v934_v46 }
 0x2ea   :  { %1765 = vmatpush1.bf16.msra.mxu0 %v1764_v41 }
 0x2eb   :  { %1767 = vmatprep.subr.bf16.mxu0 %v1766_v42 }
 0x2ee   :  { %1769 = vmatpush1.bf16.msra.mxu0 %v1768_v47 }
 0x2ef   :  { %1771 = vmatprep.subr.bf16.mxu0 %v1770_v48 }
 0x2f2   :  { %1773 = vmatpush1.bf16.msra.mxu0 %v1772_v53 }
 0x2f3   :  { %1775 = vmatprep.subr.bf16.mxu0 %v1774_v54 }
 0x2f6   :  { %1777 = vmatpush1.bf16.msra.mxu0 %v1776_v59 }
 0x2f7   :  { %1779 = vmatprep.subr.bf16.mxu0 %v1778_v60 }
 0x2fa   :  { %1781 = vmatpush1.bf16.msra.mxu0 %v1780_v63 }
 0x2fd   :  { %1222 = vmatmul.mubr.f32.vlgmr.msra.gmra.mrb[4].mxu0 %v1122_v0 }
 0x2fe   :  { %1227 = vmatprep.mubr.f32.mxu0 %v1920_v38  ;;  %v1246_v38 = vrot.slane %v894_v9, %v2125_v10 }
 0x301   :  { %1228 = vmatmul.mubr.f32.gmra.mrb[6].mxu0 %v1123_v1 }
 0x3b7   :  { %v1034_v2 = vpop.f32.mrb[6].mxu1 }
 0x3b8   :  { %v1036_v3 = vpop.f32.mrb[7].mxu1 }
 0x3bb   :  { %v1040_v6 = vpop.f32.mrb[8].mxu1 }
 0x3bc   :  { %v1042_v8 = vpop.f32.mrb[9].mxu1 }
 0x3d0   :  { %v1223_v11 = vpop.f32.mrb[4].mxu0 }
 0x3d1   :  { %v1786_v13 = vadd.f32 %v1223_v11, %v1034_v2  ;;  %v1225_v14 = vpop.f32.mrb[5].mxu0 }
 0x3d2   :  { %v1787_v15 = vadd.f32 %v1225_v14, %v1036_v3 }
 0x3d3   :  { %v1249_v16 = vadd.f32 %v1786_v13, %v1242_v12 }
 0x3d4   :  { %v1229_v17 = vpop.f32.mrb[6].mxu0  ;;  %v1250_v18 = vadd.f32 %v1787_v15, %v1246_v38 }
 0x3d5   :  { %v1788_v19 = vadd.f32 %v1229_v17, %v1040_v6  ;;  %v1231_v20 = vpop.f32.mrb[7].mxu0  ;;  %v1257_v23 = vmul.f32 0.01, %v1249_v16  ;;  %vm1253_vm14 = vcmp.gt.f32.partialorder %v1249_v16, 0.0 }
 0x3d6   :  { %v1789_v21 = vadd.f32 %v1231_v20, %v1042_v8  ;;  %v1258_v5 = vmul.f32 0.01, %v1250_v18  ;;  %vm1254_vm0 = vcmp.gt.f32.partialorder %v1250_v18, 0.0  ;;  %v1420_v20 = vld [vmem:[%s2163_s6 + $0x2] ss:$4 sm:$0x3] }
 0x3d7   :  { %v1251_v22 = vadd.f32 %v1788_v19, %v1242_v12  ;;  %v1261_v28 = vsel %vm1253_vm14, %v1249_v16, %v1257_v23  ;;  %v1419_v16 = vld [vmem:[%s2163_s6 + $0x1] ss:$4 sm:$0x3]  ;;  %s1885_s6 = scalar_lea.vmem %s1365_s26, 512 }
 0x3d8   :  { %v1252_v24 = vadd.f32 %v1789_v21, %v1246_v38  ;;  %v1262_v31 = vsel %vm1254_vm0, %v1250_v18, %v1258_v5  ;;  %v1319_v17 = vrot.slane %v1419_v16, %v2074_v7  ;;  %v1323_v18 = vrot.slane %v1419_v16, %v2125_v10  ;;  %p1886_p10 = scmp.ne.s32.totalorder %s1365_s26, %s1885_s6  ;;  %p1891_p12 = scmp.lt.s32.totalorder %s1885_s6, %s1885_s6 }
 0x3d9   :  { %vm1255_vm15 = vcmp.gt.f32.partialorder %v1251_v22, 0.0  ;;  %v1259_v25 = vmul.f32 0.01, %v1251_v22  ;;  %v1344_v5 = vrot.slane %v1420_v20, %v2074_v7 }
 0x3da   :  { %vm1256_vm1 = vcmp.gt.f32.partialorder %v1252_v24, 0.0  ;;  %v1260_v26 = vmul.f32 0.01, %v1252_v24  ;;  %p1892_p13 = por %p1891_p12, %p1890_p11 }
 0x3db   :  { %v1263_v27 = vsel %vm1255_vm15, %v1251_v22, %v1259_v25  ;;  %v1348_v25 = vrot.slane %v1420_v20, %v2125_v10 }
 0x3dc   :  { %v1266_v29 = vsel %vm1265_vm13, %v1263_v27, 0.0  ;;  %v1264_v30 = vsel %vm1256_vm1, %v1252_v24, %v1260_v26  ;;  %p1893_p0 = pnand %p1892_p13, %p1886_p10 }
 0x3dd   :  { %v1267_v32 = vadd.f32 %v1266_v29, %v1261_v28  ;;  %v1274_v33 = vsel %vm1265_vm13, %v1264_v30, 0.0 }
 0x3de   :  { %v1275_v34 = vadd.f32 %v1274_v33, %v1262_v31 }
 0x3df   :  { %v1268_v35 = vrot.slane %v1267_v32, 4 }
 0x3e0   :  { %v1276_v36 = vrot.slane %v1275_v34, 4 }
 0x3e1   :  { %v1269_v37 = vadd.f32 %v1268_v35, %v1267_v32 }
 0x3e2   :  { %v1277_v39 = vadd.f32 %v1276_v36, %v1275_v34 }
 0x3e3   :  { %v1270_v40 = vrot.slane %v1269_v37, 2 }
 0x3e4   :  { %v1278_v41 = vrot.slane %v1277_v39, 2 }
 0x3e5   :  { %v1271_v42 = vadd.f32 %v1270_v40, %v1269_v37 }
 0x3e6   :  { %v1279_v43 = vadd.f32 %v1278_v41, %v1277_v39 }
 0x3e7   :  { %v1272_v4 = vrot.slane %v1271_v42, 1 }
 0x3e8   :  { %v1280_v44 = vrot.slane %v1279_v43, 1 }
 0x3e9   :  { %v1273_v45 = vadd.f32 %v1272_v4, %v1271_v42 }
 0x3ea   :  { %v1281_v46 = vadd.f32 %v1280_v44, %v1279_v43 }
 0x3eb   :  { %v1283_v47 = vmul.f32 0.1, %v1273_v45 }
 0x3ec   :  { %v1284_v48 = vmul.f32 0.1, %v1281_v46 }
 0x3ed   :  { %v1285_v49 = vsub.f32 %v1261_v28, %v1283_v47  ;;  %v1287_v50 = vsub.f32 %v1263_v27, %v1283_v47 }
 0x3ee   :  { %v1286_v51 = vsub.f32 %v1262_v31, %v1284_v48  ;;  %v1288_v52 = vsub.f32 %v1264_v30, %v1284_v48 }
 0x3ef   :  { %v1289_v53 = vmul.f32 %v1285_v49, %v1285_v49  ;;  %v1291_v54 = vmul.f32 %v1287_v50, %v1287_v50 }
 0x3f0   :  { %v1290_v55 = vmul.f32 %v1286_v51, %v1286_v51  ;;  %v1292_v56 = vmul.f32 %v1288_v52, %v1288_v52 }
 0x3f1   :  { %v1293_v57 = vsel %vm1265_vm13, %v1291_v54, 0.0 }
 0x3f2   :  { %v1294_v58 = vadd.f32 %v1293_v57, %v1289_v53  ;;  %v1301_v59 = vsel %vm1265_vm13, %v1292_v56, 0.0 }
 0x3f3   :  { %v1302_v60 = vadd.f32 %v1301_v59, %v1290_v55 }
 0x3f4   :  { %v1295_v61 = vrot.slane %v1294_v58, 4 }
 0x3f5   :  { %v1303_v62 = vrot.slane %v1302_v60, 4 }
 0x3f6   :  { %v1296_v63 = vadd.f32 %v1295_v61, %v1294_v58 }
 0x3f7   :  { %v1304_v0 = vadd.f32 %v1303_v62, %v1302_v60 }
 0x3f8   :  { %v1297_v1 = vrot.slane %v1296_v63, 2 }
 0x3f9   :  { %v1305_v2 = vrot.slane %v1304_v0, 2 }
 0x3fa   :  { %v1298_v3 = vadd.f32 %v1297_v1, %v1296_v63 }
 0x3fb   :  { %v1306_v6 = vadd.f32 %v1305_v2, %v1304_v0 }
 0x3fc   :  { %v1299_v8 = vrot.slane %v1298_v3, 1 }
 0x3fd   :  { %v1307_v9 = vrot.slane %v1306_v6, 1 }
 0x3fe   :  { %v1300_v11 = vadd.f32 %v1299_v8, %v1298_v3 }
 0x3ff   :  { %v1308_v12 = vadd.f32 %v1307_v9, %v1306_v6 }
 0x400   :  { %v1309_v13 = vmul.f32 0.1, %v1300_v11 }
 0x401   :  { %v1310_v14 = vmul.f32 0.1, %v1308_v12 }
 0x402   :  { %v1311_v38 = vadd.f32 1e-05, %v1309_v13 }
 0x403   :  { %v1312_v15 = vadd.f32 1e-05, %v1310_v14 }
 0x404   :  { %1815 = vrsqrt.f32 %v1311_v38 }
 0x405   :  { %1817 = vrsqrt.f32 %v1312_v15 }
 0x40e   :  { %v1816_v19 = vpop.eup %1815 }
 0x40f   :  { %v1818_v21 = vpop.eup %1817  ;;  %v1326_v22 = vmul.f32 %v1816_v19, %v1319_v17 }
 0x410   :  { %v1327_v23 = vmul.f32 %v1818_v21, %v1323_v18 }
 0x411   :  { %v1331_v24 = vrot.slane %v1326_v22, %v2074_v7 }
 0x412   :  { %v1335_v26 = vrot.slane %v1327_v23, %v2074_v7 }
 0x413   :  { %v1336_v27 = vmul.f32 %v1331_v24, %v1285_v49  ;;  %v1338_v28 = vmul.f32 %v1331_v24, %v1287_v50 }
 0x414   :  { %v1337_v29 = vmul.f32 %v1335_v26, %v1286_v51  ;;  %v1339_v30 = vmul.f32 %v1335_v26, %v1288_v52 }
 0x415   :  { %v1351_v31 = vadd.f32 %v1344_v5, %v1336_v27  ;;  %v1353_v32 = vadd.f32 %v1344_v5, %v1338_v28 }
 0x416   :  { %v1352_v33 = vadd.f32 %v1348_v25, %v1337_v29  ;;  %v1354_v34 = vadd.f32 %v1348_v25, %v1339_v30 }
 0x417   :  { %1357 = vst [vmem:[#allocation14 + $0x10] sm:$0x3] %v1353_v32  ;;  %1355 = vst [vmem:[#allocation14] sm:$0xff] %v1351_v31 }
 0x418   :  { %1358 = vst [vmem:[#allocation14 + $0x18] sm:$0x3] %v1354_v34  ;;  %1356 = vst [vmem:[#allocation14 + $0x8] sm:$0xff] %v1352_v33 }
 0x419   :  { %1896 = shalt.err (!%p1893_p0)
}
 0x41a   :  { %s1897_s28 = scalar_lea.hbm %s2164_s7, 512 }
 0x41b   :  { %p1898_p1 = scmp.ne.s32.totalorder %s2164_s7, %s1897_s28  ;;  %p1901_p2 = scmp.lt.u32.totalorder %s1897_s28, %s2164_s7 }
 0x41d   :  { %p1903_p3 = pnand %p1901_p2, %p1898_p1 }
 0x41f   :  { %1906 = shalt.err (!%p1903_p3)
}
 0x420   :  { %s1922_s9 = smov 256   ;;  %s1923_s10 = smov 16  }
 0x421   :  { %1370 = dma.vmem_to_hbm [thread:$0]  %s1365_s26, 512, %s2164_s7, [#allocation11], %s1922_s9, %s1922_s9, %s1923_s10  }
 0x422   :  { %1913 = dma.done.wait [#allocation11], 512  }
 0x423   :  { %1914 = vsyncadd [#allocation11], 4294966784 }
 0x424   :  { %1374 = vsyncpa [#allocation10], 1 }
 0x425   :  { %1375 = vsyncpa [#allocation13], 1 }
 0x426   :  { %1376 = vsyncpa [#allocation11], 1 }
 0x427   :  { %1377 = vsyncmov [#allocation8] }
 0x42a   :  { %s1378_s13 = vpop.sfrf %1377 }
 0x42b   :  { %p1421_p4 = scmp.ne.s32.totalorder %s1378_s13, 0 }
 0x42d   :  { %1382 = shalt.err (%p1421_p4)  }

</bundles_post_ra>
